<compile_context>
chip_gen: v7x
topology: tpu7x:2x2x1
jax: 0.10.0
libtpu: 0.0.40
codegen_flags: <defaults>
</compile_context>

<pallas_src>
import functools

import jax
import jax.numpy as jnp
from jax.experimental import pallas as pl
from jax.experimental.pallas import tpu as pltpu


def _round_up(x, m):
    return (x + m - 1) // m * m


# ---------------------------------------------------------------------------
# Kernel 1: per-utterance token max-pool + self.mapping linear.
# ---------------------------------------------------------------------------
def _pool_map_kernel(h_ref, w_ref, b_ref, o_ref):
    L = h_ref.shape[1]
    # Running elementwise max over L slices: pure VPU work on (tn, D) slabs,
    # bounded live set, no cross-sublane reduce lowering.
    acc = h_ref[:, 0, :]
    for l in range(1, L):
        acc = jnp.maximum(acc, h_ref[:, l, :])
    y = jnp.dot(acc, w_ref[...], preferred_element_type=jnp.float32) + b_ref[...]
    o_ref[...] = y.astype(o_ref.dtype)


def _pick_row_tile(n_rows, L, D, itemsize, *, budget_bytes=10 << 20, min_steps=2):
    """Largest 8-aligned row tile whose double-buffered input block stays under
    `budget_bytes` (safe under v5e's 16 MiB default scoped-VMEM limit and
    v7x's 64 MiB physical VMEM), capped so the row grid has >= `min_steps`
    steps and a megacore chip (v7x) can shard the HBM stream across cores."""
    if n_rows <= 8:
        return n_rows
    per_row = 2 * L * D * itemsize                      # 2 = double buffer
    budget_rows = max(8, (budget_bytes // per_row) // 8 * 8)
    split_rows = _round_up(pl.cdiv(n_rows, min_steps), 8)
    return max(8, min(budget_rows, split_rows, _round_up(n_rows, 8)))


def pool_and_map(h, w_t, b, *, mxu_dtype=None):
    """(N, L, D) -> max over L -> (N, D) @ (D, U) + b, f32 accumulate."""
    N, L, D = h.shape
    U = w_t.shape[1]
    if mxu_dtype is not None and h.dtype != mxu_dtype:
        # NOTE: this is an extra HBM cast pass; ideally the producer already
        # emits bf16 so the kernel streams half the bytes with no extra pass.
        h = h.astype(mxu_dtype)
    w_t = w_t.astype(h.dtype)
    tn = _pick_row_tile(N, L, D, h.dtype.itemsize)
    cost = pl.CostEstimate(
        flops=2 * N * D * U,
        transcendentals=0,
        bytes_accessed=N * L * D * h.dtype.itemsize + N * U * 4
        + D * U * w_t.dtype.itemsize,
    )
    return pl.pallas_call(
        _pool_map_kernel,
        out_shape=jax.ShapeDtypeStruct((N, U), jnp.float32),
        grid=(pl.cdiv(N, tn),),
        in_specs=[pl.BlockSpec((tn, L, D), lambda i: (i, 0, 0)),
                  pl.BlockSpec((D, U), lambda i: (0, 0)),
                  pl.BlockSpec((1, U), lambda i: (0, 0))],
        out_specs=pl.BlockSpec((tn, U), lambda i: (i, 0)),
        compiler_params=pltpu.CompilerParams(
            dimension_semantics=("parallel",),
            vmem_limit_bytes=32 << 20),
        cost_estimate=cost,
    )(h, w_t, b.reshape(1, U))


# ---------------------------------------------------------------------------
# Kernel 2: everything after pooling, fully fused; gridded over bsz.
# ---------------------------------------------------------------------------
def _fused_kernel(mapped_ref, emo_rows_ref, adj_ref,
                  emo_lin_w_ref, emo_top_ref, emo_bot_ref,
                  o_proj_w_ref, mlp_w1_ref, mlp_w2_ref,
                  bias_ref, o_ref, *, nhead, eps):
    f32 = jnp.float32
    B, S, U = mapped_ref.shape                 # B == 1 per grid step
    E = emo_lin_w_ref.shape[1]                 # emotion_dim
    Fd = mlp_w1_ref.shape[1]                   # ff_dim
    Dh = U // nhead

    # Unpack the single packed bias/gamma/beta array (8 rows, padded to W).
    biases = bias_ref[...]
    emo_lin_b = biases[0:1, :E]
    emo_map_b = biases[1:2, :U]
    norm_g = biases[2:3, :U]
    norm_b = biases[3:4, :U]
    mlp_b1 = biases[4:5, :Fd]
    mlp_b2 = biases[5:6, :U]
    mlp_norm_g = biases[6:7, :U]
    mlp_norm_b = biases[7:8, :U]

    mapped = mapped_ref[...]                                        # (B, S, U)

    # --- emotion_lin(emotion_embeddings(label))
    emo_lin = jnp.einsum('bsd,de->bse', emo_rows_ref[...], emo_lin_w_ref[...],
                         preferred_element_type=f32) + emo_lin_b

    # --- emotion_mapping(cat([mapped, emo_lin], -1)) with the concat folded
    #     away: weight split into top (utter rows) and bottom (emotion rows).
    utter = (jnp.einsum('bsu,uv->bsv', mapped, emo_top_ref[...],
                        preferred_element_type=f32)
             + jnp.einsum('bse,ev->bsv', emo_lin, emo_bot_ref[...],
                          preferred_element_type=f32)
             + emo_map_b)                                           # (B, S, U)

    # --- MultiHeadAttention: the reference forward uses q = k = v = x with no
    #     input projections (only o_proj_weight).  Head split/merge done with
    #     lane masks so nothing leaves vregs.
    # TODO(synk): reference's `attn_sum.transpose(0,1).view(bsz, slen, -1)` is
    # interpreted as the standard per-batch head merge.
    adj = adj_ref[...].astype(f32)                                  # (B, S, S)
    neg_mask = (1.0 - adj) * 1e30                                   # mask_logic
    scaling = float(Dh) ** -0.5
    lane = jax.lax.broadcasted_iota(jnp.int32, (1, 1, U), 2)

    ctx_sum = jnp.zeros((B, S, U), f32)
    for h in range(nhead):                                          # static unroll
        hmask = jnp.logical_and(lane >= h * Dh,
                                lane < (h + 1) * Dh).astype(f32)    # (1, 1, U)
        xh = utter * hmask                                          # head-h cols only
        scores = jnp.einsum('biu,bju->bij', xh, xh,
                            preferred_element_type=f32) * scaling
        scores = scores - neg_mask
        m = jnp.max(scores, axis=2, keepdims=True)
        e = jnp.exp(scores - m)
        p = e / jnp.sum(e, axis=2, keepdims=True)                   # exact softmax
        ctx_sum = ctx_sum + jnp.einsum('bij,bju->biu', p, xh,
                                       preferred_element_type=f32)
    # o_proj hoisted out of the head loop (ctx_h is zero outside head h's cols,
    # so a single matmul on the accumulated context is mathematically identical).
    x2 = jnp.einsum('biu,uv->biv', ctx_sum, o_proj_w_ref[...],
                    preferred_element_type=f32)

    def layernorm(x, g, b):
        mu = jnp.mean(x, axis=-1, keepdims=True)
        xc = x - mu
        var = jnp.mean(xc * xc, axis=-1, keepdims=True)
        return xc * jax.lax.rsqrt(var + eps) * g + b

    # TODO(synk): att/pag/mlp dropout layers treated as identity (p=0 / eval).
    ss = layernorm(utter + x2, norm_g, norm_b)                      # (B, S, U)

    h1 = jnp.maximum(
        jnp.einsum('bsu,uf->bsf', ss, mlp_w1_ref[...],
                   preferred_element_type=f32) + mlp_b1, 0.0)
    l2 = jnp.einsum('bsf,fu->bsu', h1, mlp_w2_ref[...],
                    preferred_element_type=f32) + mlp_b2
    out = layernorm(l2 + ss, mlp_norm_g, mlp_norm_b)
    o_ref[...] = out.astype(o_ref.dtype)


def fused_post_pool(mapped3, emo_rows3, adj, p, *, nhead, eps=1e-5):
    bsz, slen, U = mapped3.shape
    E = p['emo_lin_b'].shape[0]
    Fd = p['mlp_b1'].shape[0]
    W = max(E, U, Fd)

    def pad_row(v):
        return jnp.pad(v, (0, W - v.shape[0])).reshape(1, W)

    # Pack the 8 tiny bias/gamma/beta vectors into one (8, W) array -> 1 DMA.
    bias_pack = jnp.concatenate([
        pad_row(p['emo_lin_b']), pad_row(p['emo_map_b']),
        pad_row(p['norm_g']), pad_row(p['norm_b']),
        pad_row(p['mlp_b1']), pad_row(p['mlp_b2']),
        pad_row(p['mlp_norm_g']), pad_row(p['mlp_norm_b'])], axis=0)

    emo_top = p['emo_map_w_t'][:U, :]      # multiplies mapped  (utter rows)
    emo_bot = p['emo_map_w_t'][U:, :]      # multiplies emo_lin (emotion rows)
    args = (mapped3, emo_rows3, adj.astype(jnp.float32),
            p['emo_lin_w_t'], emo_top, emo_bot,
            p['o_proj_w_t'], p['mlp_w1_t'], p['mlp_w2_t'], bias_pack)

    in_specs = [
        pl.BlockSpec((1, slen, U), lambda b: (b, 0, 0)),
        pl.BlockSpec((1, slen, emo_rows3.shape[-1]), lambda b: (b, 0, 0)),
        pl.BlockSpec((1, slen, slen), lambda b: (b, 0, 0)),
        pl.BlockSpec(p['emo_lin_w_t'].shape, lambda b: (0, 0)),
        pl.BlockSpec(emo_top.shape, lambda b: (0, 0)),
        pl.BlockSpec(emo_bot.shape, lambda b: (0, 0)),
        pl.BlockSpec(p['o_proj_w_t'].shape, lambda b: (0, 0)),
        pl.BlockSpec(p['mlp_w1_t'].shape, lambda b: (0, 0)),
        pl.BlockSpec(p['mlp_w2_t'].shape, lambda b: (0, 0)),
        pl.BlockSpec(bias_pack.shape, lambda b: (0, 0)),
    ]
    return pl.pallas_call(
        functools.partial(_fused_kernel, nhead=nhead, eps=eps),
        out_shape=jax.ShapeDtypeStruct((bsz, slen, U), jnp.float32),
        grid=(bsz,),                       # batch rows independent -> megacore
        in_specs=in_specs,
        out_specs=pl.BlockSpec((1, slen, U), lambda b: (b, 0, 0)),
        compiler_params=pltpu.CompilerParams(
            dimension_semantics=("parallel",),
            vmem_limit_bytes=32 << 20),
    )(*args)


# ------------------------- parameters & forward -----------------------------

def init_params(key, token_dim, utter_dim, emo_num, emo_emb_dim, emotion_dim, ff_dim):
    ks = jax.random.split(key, 8)

    def xavier(k, shape):                 # shape = (out_features, in_features)
        limit = (6.0 / (shape[0] + shape[1])) ** 0.5
        return jax.random.uniform(k, shape, jnp.float32, -limit, limit)

    p = {}
    p['mapping_w_t'] = xavier(ks[0], (utter_dim, token_dim)).T
    p['mapping_b'] = jnp.zeros((utter_dim,), jnp.float32)
    p['emotion_emb'] = jax.random.normal(ks[1], (emo_num, emo_emb_dim), jnp.float32)
    p['emo_lin_w_t'] = xavier(ks[2], (emotion_dim, emo_emb_dim)).T
    p['emo_lin_b'] = jnp.zeros((emotion_dim,), jnp.float32)
    p['emo_map_w_t'] = xavier(ks[3], (utter_dim, utter_dim + emotion_dim)).T
    p['emo_map_b'] = jnp.zeros((utter_dim,), jnp.float32)
    p['o_proj_w_t'] = xavier(ks[4], (utter_dim, utter_dim)).T
    p['norm_g'] = jnp.ones((utter_dim,), jnp.float32)
    p['norm_b'] = jnp.zeros((utter_dim,), jnp.float32)
    p['mlp_w1_t'] = xavier(ks[5], (ff_dim, utter_dim)).T
    p['mlp_b1'] = jnp.zeros((ff_dim,), jnp.float32)
    p['mlp_w2_t'] = xavier(ks[6], (utter_dim, ff_dim)).T
    p['mlp_b2'] = jnp.zeros((utter_dim,), jnp.float32)
    p['mlp_norm_g'] = jnp.ones((utter_dim,), jnp.float32)
    p['mlp_norm_b'] = jnp.zeros((utter_dim,), jnp.float32)
    return p


def utter_encoder_forward(params, conv_hidden, attention_mask, adj, emotion_label,
                          *, nhead, mxu_dtype=jnp.bfloat16):
    # TODO(synk): RobertaModel.from_pretrained('roberta-base') has no in-script
    # equivalent; `conv_hidden` plays the role of encoder(...).last_hidden_state.
    # attention_mask is unused (the reference max-pool ignores it too).
    del attention_mask
    bsz, slen, L, token_dim = conv_hidden.shape
    utter_dim = params['mapping_w_t'].shape[1]

    # Kernel 1: token max-pool + mapping (loop + pad_sequence with equal-length
    # conversations == plain stack), streamed/tiled over bsz*slen.
    h = conv_hidden.reshape(bsz * slen, L, token_dim)
    mapped3 = pool_and_map(h, params['mapping_w_t'], params['mapping_b'],
                           mxu_dtype=mxu_dtype).reshape(bsz, slen, utter_dim)

    # Tiny embedding gather stays in XLA (fuses there; not worth a launch).
    emo_rows3 = jnp.take(params['emotion_emb'], emotion_label.reshape(-1),
                         axis=0).reshape(bsz, slen, -1)

    # Kernel 2: everything else, fused.
    return fused_post_pool(mapped3, emo_rows3, adj, params, nhead=nhead)


# ---------------------------------- main ------------------------------------

if __name__ == "__main__":
    key = jax.random.PRNGKey(0)
    bsz, slen, seq_len = 2, 6, 8
    token_dim, utter_dim = 768, 32
    emo_num, emo_emb_dim, emotion_dim = 7, 16, 8
    ff_dim, nhead = 64, 4

    kp, kh, ke = jax.random.split(key, 3)
    params = init_params(kp, token_dim, utter_dim, emo_num, emo_emb_dim,
                         emotion_dim, ff_dim)

    # Producer (RoBERTa stand-in) emits bf16 so kernel 1 streams half the bytes.
    conv_hidden = jax.random.normal(
        kh, (bsz, slen, seq_len, token_dim), jnp.float32).astype(jnp.bfloat16)
    attention_mask = jnp.ones((bsz, slen, seq_len), jnp.int32)   # unused (see TODO)
    emotion_label = jax.random.randint(ke, (bsz, slen), 0, emo_num)
    # adjacency: each utterance attends to itself and its history
    adj = jnp.broadcast_to(jnp.tril(jnp.ones((slen, slen), jnp.float32)),
                           (bsz, slen, slen))

    out = utter_encoder_forward(params, conv_hidden, attention_mask, adj,
                                emotion_label, nhead=nhead)
    jax.block_until_ready(out)
    assert out.shape == (bsz, slen, utter_dim) and out.dtype == jnp.float32
    print("KERNEL_OK")
</pallas_src>

<mosaic_0001>
module attributes {stable_mosaic.version = 11 : i64} {
  func.func @_pool_map_kernel(%arg0: i32, %arg1: memref<8x8x768xbf16, #tpu.memory_space<vmem>>, %arg2: memref<768x32xbf16, #tpu.memory_space<vmem>>, %arg3: memref<1x32xf32, #tpu.memory_space<vmem>>, %arg4: memref<8x32xf32, #tpu.memory_space<vmem>>) attributes {dimension_semantics = [#tpu.dimension_semantics<parallel>], iteration_bounds = array<i64: 2>, scalar_prefetch = 0 : i64, scratch_operands = 0 : i64, tpu.core_type = #tpu.core_type<tc>, window_params = [{transform_indices = @transform_0, window_bounds = array<i64: 8, 8, 768>}, {pipeline_mode = #tpu.pipeline_mode<synchronous>, transform_indices = @transform_1, window_bounds = array<i64: 768, 32>}, {pipeline_mode = #tpu.pipeline_mode<synchronous>, transform_indices = @transform_2, window_bounds = array<i64: 1, 32>}, {transform_indices = @transform_3, window_bounds = array<i64: 8, 32>}]} {
    %c0 = arith.constant 0 : index
    %c0_0 = arith.constant 0 : index
    %c0_1 = arith.constant 0 : index
    %0 = vector.load %arg1[%c0, %c0_0, %c0_1] : memref<8x8x768xbf16, #tpu.memory_space<vmem>>, vector<8x1x768xbf16>
    %1 = vector.shape_cast %0 : vector<8x1x768xbf16> to vector<8x768xbf16>
    %c0_2 = arith.constant 0 : index
    %c1 = arith.constant 1 : index
    %c0_3 = arith.constant 0 : index
    %2 = vector.load %arg1[%c0_2, %c1, %c0_3] : memref<8x8x768xbf16, #tpu.memory_space<vmem>>, vector<8x1x768xbf16>
    %3 = vector.shape_cast %2 : vector<8x1x768xbf16> to vector<8x768xbf16>
    %4 = arith.maximumf %1, %3 : vector<8x768xbf16>
    %c0_4 = arith.constant 0 : index
    %c2 = arith.constant 2 : index
    %c0_5 = arith.constant 0 : index
    %5 = vector.load %arg1[%c0_4, %c2, %c0_5] : memref<8x8x768xbf16, #tpu.memory_space<vmem>>, vector<8x1x768xbf16>
    %6 = vector.shape_cast %5 : vector<8x1x768xbf16> to vector<8x768xbf16>
    %7 = arith.maximumf %4, %6 : vector<8x768xbf16>
    %c0_6 = arith.constant 0 : index
    %c3 = arith.constant 3 : index
    %c0_7 = arith.constant 0 : index
    %8 = vector.load %arg1[%c0_6, %c3, %c0_7] : memref<8x8x768xbf16, #tpu.memory_space<vmem>>, vector<8x1x768xbf16>
    %9 = vector.shape_cast %8 : vector<8x1x768xbf16> to vector<8x768xbf16>
    %10 = arith.maximumf %7, %9 : vector<8x768xbf16>
    %c0_8 = arith.constant 0 : index
    %c4 = arith.constant 4 : index
    %c0_9 = arith.constant 0 : index
    %11 = vector.load %arg1[%c0_8, %c4, %c0_9] : memref<8x8x768xbf16, #tpu.memory_space<vmem>>, vector<8x1x768xbf16>
    %12 = vector.shape_cast %11 : vector<8x1x768xbf16> to vector<8x768xbf16>
    %13 = arith.maximumf %10, %12 : vector<8x768xbf16>
    %c0_10 = arith.constant 0 : index
    %c5 = arith.constant 5 : index
    %c0_11 = arith.constant 0 : index
    %14 = vector.load %arg1[%c0_10, %c5, %c0_11] : memref<8x8x768xbf16, #tpu.memory_space<vmem>>, vector<8x1x768xbf16>
    %15 = vector.shape_cast %14 : vector<8x1x768xbf16> to vector<8x768xbf16>
    %16 = arith.maximumf %13, %15 : vector<8x768xbf16>
    %c0_12 = arith.constant 0 : index
    %c6 = arith.constant 6 : index
    %c0_13 = arith.constant 0 : index
    %17 = vector.load %arg1[%c0_12, %c6, %c0_13] : memref<8x8x768xbf16, #tpu.memory_space<vmem>>, vector<8x1x768xbf16>
    %18 = vector.shape_cast %17 : vector<8x1x768xbf16> to vector<8x768xbf16>
    %19 = arith.maximumf %16, %18 : vector<8x768xbf16>
    %c0_14 = arith.constant 0 : index
    %c7 = arith.constant 7 : index
    %c0_15 = arith.constant 0 : index
    %20 = vector.load %arg1[%c0_14, %c7, %c0_15] : memref<8x8x768xbf16, #tpu.memory_space<vmem>>, vector<8x1x768xbf16>
    %21 = vector.shape_cast %20 : vector<8x1x768xbf16> to vector<8x768xbf16>
    %22 = arith.maximumf %19, %21 : vector<8x768xbf16>
    %c0_16 = arith.constant 0 : index
    %c0_17 = arith.constant 0 : index
    %23 = vector.load %arg2[%c0_16, %c0_17] : memref<768x32xbf16, #tpu.memory_space<vmem>>, vector<768x32xbf16>
    %cst = arith.constant dense<0.000000e+00> : vector<8x32xf32>
    %24 = tpu.matmul %22, %23, %cst {dimension_numbers = #tpu.dot_dimension_numbers<[1], [0], [0], [1], [0, 0, 1, 1], [], []>} : vector<8x768xbf16>, vector<768x32xbf16>, vector<8x32xf32> -> vector<8x32xf32>
    %c0_18 = arith.constant 0 : index
    %c0_19 = arith.constant 0 : index
    %25 = vector.load %arg3[%c0_18, %c0_19] : memref<1x32xf32, #tpu.memory_space<vmem>>, vector<1x32xf32>
    %26 = vector.broadcast %25 : vector<1x32xf32> to vector<8x32xf32>
    %27 = arith.addf %24, %26 : vector<8x32xf32>
    %c0_20 = arith.constant 0 : index
    %c0_21 = arith.constant 0 : index
    %28 = vector.load %arg4[%c0_20, %c0_21] : memref<8x32xf32, #tpu.memory_space<vmem>>, vector<8x32xf32>
    tpu.vector_store %arg4[%c0_20, %c0_21], %27 {strides = array<i32>} : memref<8x32xf32, #tpu.memory_space<vmem>>, vector<8x32xf32>,
    return
  }
  func.func @transform_0(%arg0: i32) -> (i32, i32, i32) {
    %c0_i32 = arith.constant 0 : i32
    %c0_i32_0 = arith.constant 0 : i32
    %c0_i32_1 = arith.constant 0 : i32
    return %arg0, %c0_i32, %c0_i32_0 : i32, i32, i32
  }
  func.func @transform_1(%arg0: i32) -> (i32, i32) {
    %c0_i32 = arith.constant 0 : i32
    %c0_i32_0 = arith.constant 0 : i32
    %c0_i32_1 = arith.constant 0 : i32
    return %c0_i32, %c0_i32_0 : i32, i32
  }
  func.func @transform_2(%arg0: i32) -> (i32, i32) {
    %c0_i32 = arith.constant 0 : i32
    %c0_i32_0 = arith.constant 0 : i32
    %c0_i32_1 = arith.constant 0 : i32
    return %c0_i32, %c0_i32_0 : i32, i32
  }
  func.func @transform_3(%arg0: i32) -> (i32, i32) {
    %c0_i32 = arith.constant 0 : i32
    %c0_i32_0 = arith.constant 0 : i32
    return %arg0, %c0_i32 : i32, i32
  }
}

</mosaic_0001>

<bundles_post_ra>
// kernel: tpu_custom_call.1
= control target key start
LH: loop header
LB: loop body
LE: loop exit
PB: predicated region body
PF: predicated region fallthrough
CT: control target
= control target key end

     0   :  { %8 = vsyncpa [#allocation3], 0  ;;  %s3090_s0 = inlined_call_operand.vmem [shape: bf16[12,8,768], index: 0, kind: input, shape index: {}]   ;;  %s3091_s1 = inlined_call_operand.vmem [shape: bf16[768,32], index: 1, kind: input, shape index: {}]   ;;  %s3092_s2 = inlined_call_operand.vmem [shape: f32[1,32], index: 2, kind: input, shape index: {}]   ;;  %s3093_s3 = inlined_call_operand.hbm [shape: f32[12,32], index: 3, kind: output, shape index: {}]  }
   0x1   :  { %10 = vsyncpa [#allocation3 + $0x1], 0  ;;  %s2700_s12 = smov 0   ;;  %s2702_s13 = smov 0  }
   0x2   :  { %s2704_s14 = smov 0   ;;  %s2706_s15 = smov 0  }
   0x3 LB: > { %s2721_s16 = sadd.s32 4294967295, %s2677_s15   ;;  %s2185_s17 = sadd.s32 4294967294, %s2677_s15   ;;  %s2677_s15 = sphi %s2706_s15, %s3099_s15   ;;  %s2673_s14 = sphi %s2704_s14, %s3098_s14   ;;  %s2669_s13 = sphi %s2702_s13, %s3097_s13   ;;  %s2665_s12 = sphi %s2700_s12, %s3096_s12  }
   0x4   : > { %s2725_s18 = sadd.s32 1, %s2677_s15   ;;  %s91_s19 = sadd.s32 1, %s2673_s14 }
   0x5   : > { %s88_s20 = ssub.s32 %s2677_s15, %s2725_s18  ;;  %p101_p0 = scmp.ne.s32.totalorder %s2673_s14, %s2669_s13 }
   0x6   : > { %p89_p1 = scmp.eq.s32.totalorder %s88_s20, 0  ;;  %p102_p2 = scmp.eq.s32.totalorder %s2721_s16, 1 }
   0x7   : > { %p107_p3 = scmp.ne.s32.totalorder %s2669_s13, %s2665_s12  ;;  %p108_p4 = scmp.eq.s32.totalorder %s2185_s17, 1 }
   0x8   : > { %s2736_s21 = scalar_select %p89_p1, %s2673_s14, %s91_s19  }
   0x9   : > { %p2738_p5 = por %p102_p2, %p101_p0  ;;  %p2742_p6 = por %p108_p4, %p107_p3 }
   0xa   : > { %p2188_p7 = scmp.ge.s32.totalorder %s2677_s15, 1  ;;  %p152_p8 = scmp.lt.s32.totalorder %s2677_s15, 3 }
   0xc   : > { %p153_p9 = pnand %p2188_p7, %p152_p8 }
   0xd   : > { %v2567_v0 = vld [vmem:[%s3091_s1 + $0x40] sm:$0xff] (!%p153_p9)   ;;  %v2570_v3 = vld [vmem:[%s3091_s1 + $0x48] sm:$0xff] (!%p153_p9)   ;;  %v2574_v7 = vld [vmem:[%s3091_s1 + $0x50] sm:$0xff] (!%p153_p9)   ;;  %s2190_s7 = sshll.u32 (!%p153_p9), %s2721_s16, 3  ;;  %vm1600_vm0 = vcmask (!%p153_p9), 1041409   ;;  %vm1603_vm1 = vcmask (!%p153_p9), 1042434  }
   0xe   : > { %156 = sbr.rel (%p153_p9) target bundleno = 413 (0x19d), region = 32  ;;  %v2568_v1 = vld [vmem:[%s3091_s1] sm:$0xff] (!%p153_p9)   ;;  %2461 = vmatprep.subr.bf16.mxu0 (!%p153_p9), %v2567_v0  ;;  %v2572_v5 = vld [vmem:[%s3091_s1 + $0x8] sm:$0xff] (!%p153_p9)   ;;  %v2576_v9 = vld [vmem:[%s3091_s1 + $0x10] sm:$0xff] (!%p153_p9)   ;;  %p188_p10 = scmp.lt.s32.totalorder (!%p153_p9), %s2190_s7, 11  ;;  %vm1606_vm2 = vcmask (!%p153_p9), 1043459  }
   0xf   : > { %v2569_v2 = vld [vmem:[%s3091_s1 + $0xc0] sm:$0xff] (!%p153_p9)   ;;  %2462 = vmatpush3.bf16.msra.mxu0 (!%p153_p9), %v2568_v1  ;;  %v2573_v6 = vld [vmem:[%s3091_s1 + $0xc8] sm:$0xff] (!%p153_p9)   ;;  %v2577_v10 = vld [vmem:[%s3091_s1 + $0xd0] sm:$0xff] (!%p153_p9)   ;;  %vm1609_vm3 = vcmask (!%p153_p9), 1044484   ;;  %vm1612_vm4 = vcmask (!%p153_p9), 1045509   ;;  %vm1615_vm5 = vcmask (!%p153_p9), 1046534  }
  0x10   : > { %2483 = vmatprep.subr.bf16.mxu1 (!%p153_p9), %v2569_v2  ;;  %v2571_v4 = vld [vmem:[%s3091_s1 + $0x80] sm:$0xff] (!%p153_p9)   ;;  %2463 = vmatprep.subr.bf16.mxu0 (!%p153_p9), %v2570_v3  ;;  %v2575_v8 = vld [vmem:[%s3091_s1 + $0x88] sm:$0xff] (!%p153_p9)   ;;  %v2578_v11 = vld [vmem:[%s3091_s1 + $0x58] sm:$0xff] (!%p153_p9)   ;;  %vm1618_vm6 = vcmask (!%p153_p9), 1047559   ;;  %s179_s17 = sand.u32 (!%p153_p9), 1, %s2669_s13   ;;  %s2458_s20 = sshll.u32 (!%p153_p9), %s2721_s16, 7 }
  0x11   : > { %2484 = vmatpush3.bf16.msra.mxu1 (!%p153_p9), %v2571_v4  ;;  %v2579_v12 = vld [vmem:[%s3091_s1 + $0x90] sm:$0xff] (!%p153_p9)   ;;  %v2580_v13 = vld [vmem:[%s3091_s1 + $0x18] sm:$0xff] (!%p153_p9)   ;;  %v2582_v15 = vld [vmem:[%s3091_s1 + $0x60] sm:$0xff] (!%p153_p9)   ;;  %vm2110_vm7 = vcmask (!%p153_p9), 261120   ;;  %s3048_s28 = scalar_lea.hbm (!%p153_p9), %s3093_s3, %s2458_s20  ;;  %s2113_s29 = scalar_lea.sflag (!%p153_p9), [#allocation3], %s179_s17 }
  0x12   : > { %2485 = vmatprep.subr.bf16.mxu1 (!%p153_p9), %v2573_v6  ;;  %v2581_v14 = vld [vmem:[%s3091_s1 + $0xd8] sm:$0xff] (!%p153_p9)   ;;  %v2584_v17 = vld [vmem:[%s3091_s1 + $0x20] sm:$0xff] (!%p153_p9)   ;;  %v2586_v19 = vld [vmem:[%s3091_s1 + $0x68] sm:$0xff] (!%p153_p9)   ;;  %s2679_s30 = smov (!%p153_p9), [#allocation2]  }
  0x13   : > { %2464 = vmatpush3.bf16.msra.mxu0 (!%p153_p9), %v2572_v5  ;;  %v2583_v16 = vld [vmem:[%s3091_s1 + $0x98] sm:$0xff] (!%p153_p9)   ;;  %v2585_v18 = vld [vmem:[%s3091_s1 + $0xe0] sm:$0xff] (!%p153_p9)   ;;  %v2588_v21 = vld [vmem:[%s3091_s1 + $0x28] sm:$0xff] (!%p153_p9)  }
  0x14   : > { %2465 = vmatprep.subr.bf16.mxu0 (!%p153_p9), %v2574_v7  ;;  %v2587_v20 = vld [vmem:[%s3091_s1 + $0xa0] sm:$0xff] (!%p153_p9)   ;;  %v2589_v22 = vld [vmem:[%s3091_s1 + $0xe8] sm:$0xff] (!%p153_p9)   ;;  %v2590_v23 = vld [vmem:[%s3091_s1 + $0x70] sm:$0xff] (!%p153_p9)  }
  0x15   : > { %2486 = vmatpush3.bf16.msra.mxu1 %v2575_v8  ;;  %s3101_s7 = smov (!%p188_p10, %s2190_s7), 11  ;;  %v2591_v24 = vld [vmem:[%s3091_s1 + $0xa8] sm:$0xff]   ;;  %v2592_v25 = vld [vmem:[%s3091_s1 + $0x30] sm:$0xff]   ;;  %v2594_v27 = vld [vmem:[%s3091_s1 + $0x78] sm:$0xff]  }
  0x16   : > { %2487 = vmatprep.subr.bf16.mxu1 %v2577_v10  ;;  %s2527_s19 = smul.u32 24, %s3101_s7  ;;  %v2593_v26 = vld [vmem:[%s3091_s1 + $0xf0] sm:$0xff]   ;;  %v2596_v29 = vld [vmem:[%s3091_s1 + $0x38] sm:$0xff]   ;;  %s2619_s7 = sshll.u32 %s2679_s30, 4  ;;  %s2620_s7 = int_to_ptr.vmem [resolvable:$false] %s2619_s7 }
  0x17   : > { %2466 = vmatpush3.bf16.msra.mxu0 %v2576_v9  ;;  %v2595_v28 = vld [vmem:[%s3091_s1 + $0xb0] sm:$0xff]   ;;  %v2597_v30 = vld [vmem:[%s3091_s1 + $0xf8] sm:$0xff]   ;;  %s2621_s4 = scalar_lea.vmem %s2620_s7, 256 }
  0x18   : > { %2467 = vmatprep.subr.bf16.mxu0 %v2578_v11  ;;  %s2839_s5 = scalar_lea.vmem %s3090_s0, %s2527_s19  ;;  %s2189_s19 = sshll.u32 %s179_s17, 3 }
  0x19   : > { %2488 = vmatpush3.bf16.msra.mxu1 %v2579_v12  ;;  %v200_v31 = vld [vmem:[%s2839_s5] sm:$0x11]  ;;  %v203_v32 = vld [vmem:[%s2839_s5 + $0x18] sm:$0x11]  ;;  %v206_v33 = vld [vmem:[%s2839_s5 + $0x30] sm:$0x11] }
  0x1a   : > { %2489 = vmatprep.subr.bf16.mxu1 %v2581_v14  ;;  %v209_v34 = vld [vmem:[%s2839_s5 + $0x48] sm:$0x11]  ;;  %v212_v35 = vld [vmem:[%s2839_s5 + $0x60] sm:$0x11]  ;;  %v215_v36 = vld [vmem:[%s2839_s5 + $0x78] sm:$0x11] }
  0x1b   : > { %2468 = vmatpush3.bf16.msra.mxu0 %v2580_v13  ;;  %v218_v37 = vld [vmem:[%s2839_s5 + $0x90] sm:$0x11]  ;;  %v221_v38 = vld [vmem:[%s2839_s5 + $0xa8] sm:$0x11]  ;;  %v225_v39 = vshrl.u32 %v200_v31, 16  ;;  %v240_v40 = vshrl.u32 %v203_v32, 16 }
  0x1c   : > { %2469 = vmatprep.subr.bf16.mxu0 %v2582_v15  ;;  %v255_v41 = vshrl.u32 %v206_v33, 16  ;;  %v270_v42 = vshrl.u32 %v209_v34, 16  ;;  %v285_v43 = vshrl.u32 %v212_v35, 16  ;;  %v300_v44 = vshrl.u32 %v215_v36, 16  ;;  %v392_v45 = vld [vmem:[%s2839_s5] sm:$0x22] }
  0x1d   : > { %2490 = vmatpush3.bf16.msra.mxu1 %v2583_v16  ;;  %v315_v46 = vshrl.u32 %v218_v37, 16  ;;  %v330_v47 = vshrl.u32 %v221_v38, 16  ;;  %v368_v48 = vmax.bf16 %v225_v39, %v200_v31  ;;  %v371_v49 = vmax.bf16 %v240_v40, %v203_v32  ;;  %v395_v50 = vld [vmem:[%s2839_s5 + $0x18] sm:$0x22]  ;;  %v398_v51 = vld [vmem:[%s2839_s5 + $0x30] sm:$0x22] }
  0x1e   : > { %2491 = vmatprep.subr.bf16.mxu1 %v2585_v18  ;;  %v374_v52 = vmax.bf16 %v255_v41, %v206_v33  ;;  %v377_v53 = vmax.bf16 %v270_v42, %v209_v34  ;;  %v380_v54 = vmax.bf16 %v285_v43, %v212_v35  ;;  %v383_v55 = vmax.bf16 %v300_v44, %v215_v36  ;;  %v401_v56 = vld [vmem:[%s2839_s5 + $0x48] sm:$0x22]  ;;  %v404_v57 = vld [vmem:[%s2839_s5 + $0x60] sm:$0x22]  ;;  %v407_v58 = vld [vmem:[%s2839_s5 + $0x78] sm:$0x22] }
  0x1f   : > { %2470 = vmatpush3.bf16.msra.mxu0 %v2584_v17  ;;  %v386_v59 = vmax.bf16 %v315_v46, %v218_v37  ;;  %v389_v60 = vmax.bf16 %v330_v47, %v221_v38  ;;  %v410_v61 = vld [vmem:[%s2839_s5 + $0x90] sm:$0x22]  ;;  %v413_v62 = vld [vmem:[%s2839_s5 + $0xa8] sm:$0x22]  ;;  %v2216_v63 = vrot.slane %v392_v45, 9  ;;  %v2219_v0 = vrot.slane %v395_v50, 9 }
  0x20   : > { %2471 = vmatprep.subr.bf16.mxu0 %v2586_v19  ;;  %v2222_v1 = vrot.slane %v398_v51, 9  ;;  %v2225_v2 = vrot.slane %v401_v56, 9  ;;  %v2228_v3 = vrot.slane %v404_v57, 9  ;;  %v2231_v4 = vrot.slane %v407_v58, 9  ;;  %v713_v32 = vld [vmem:[%s2839_s5 + $0x48] sm:$0x44] }
  0x21   : > { %2492 = vmatpush3.bf16.msra.mxu1 %v2587_v20  ;;  %v2234_v5 = vrot.slane %v410_v61, 9  ;;  %v2237_v6 = vrot.slane %v413_v62, 9  ;;  %v512_v7 = vmax.bf16 %v2216_v63, %v368_v48  ;;  %v515_v8 = vmax.bf16 %v2219_v0, %v371_v49  ;;  %v716_v37 = vld [vmem:[%s2839_s5 + $0x60] sm:$0x44]  ;;  %v719_v38 = vld [vmem:[%s2839_s5 + $0x78] sm:$0x44] }
  0x22   : > { %2493 = vmatprep.subr.bf16.mxu1 %v2589_v22  ;;  %v518_v9 = vmax.bf16 %v2222_v1, %v374_v52  ;;  %v521_v10 = vmax.bf16 %v2225_v2, %v377_v53  ;;  %v524_v11 = vmax.bf16 %v2228_v3, %v380_v54  ;;  %v527_v12 = vmax.bf16 %v2231_v4, %v383_v55  ;;  %v707_v22 = vld [vmem:[%s2839_s5 + $0x18] sm:$0x44]  ;;  %v722_v43 = vld [vmem:[%s2839_s5 + $0x90] sm:$0x44]  ;;  %v725_v44 = vld [vmem:[%s2839_s5 + $0xa8] sm:$0x44] }
  0x23   : > { %2472 = vmatpush3.bf16.msra.mxu0 %v2588_v21  ;;  %v530_v13 = vmax.bf16 %v2234_v5, %v386_v59  ;;  %v533_v14 = vmax.bf16 %v2237_v6, %v389_v60  ;;  %v537_v15 = vshrl.u32 %v392_v45, 16  ;;  %v552_v16 = vshrl.u32 %v395_v50, 16  ;;  %v704_v21 = vld [vmem:[%s2839_s5] sm:$0x44]  ;;  %v2598_v53 = vld [vmem:[%s3091_s1 + $0xb8] sm:$0xff]   ;;  %s181_s24 = scalar_lea.vmem [#allocation2], %s2189_s19 }
  0x24   : > { %2473 = vmatprep.subr.bf16.mxu0 %v2590_v23  ;;  %v567_v17 = vshrl.u32 %v398_v51, 16  ;;  %v582_v18 = vshrl.u32 %v401_v56, 16  ;;  %v597_v19 = vshrl.u32 %v404_v57, 16  ;;  %v612_v20 = vshrl.u32 %v407_v58, 16  ;;  %v2599_v54 = vld [vmem:[%s3091_s1 + $0x140] sm:$0xff]   ;;  %s2126_s25 = sshll.u32 %s181_s24, 4  ;;  %s3050_s25 = int_to_ptr.vmem [resolvable:$true] %s2126_s25 }
  0x25   : > { %2494 = vmatpush3.bf16.msra.mxu1 %v2591_v24  ;;  %v2240_v23 = vrot.slane %v537_v15, 9  ;;  %v2243_v24 = vrot.slane %v552_v16, 9  ;;  %v2264_v47 = vrot.slane %v704_v21, 10  ;;  %v2267_v48 = vrot.slane %v707_v22, 10  ;;  %s2615_s16 = scalar_lea.vmem %s3050_s25, 128  ;;  %p2622_p0 = scmp.lt.s32.totalorder %s3050_s25, %s2620_s7 }
  0x26   : > { %2495 = vmatprep.subr.bf16.mxu1 %v2593_v26  ;;  %v642_v26 = vshrl.u32 %v413_v62, 16  ;;  %v2255_v31 = vrot.slane %v612_v20, 9  ;;  %v2273_v50 = vrot.slane %v713_v32, 10  ;;  %v2276_v51 = vrot.slane %v716_v37, 10  ;;  %p2616_p11 = scmp.ne.s32.totalorder %s3050_s25, %s2615_s16  ;;  %p2623_p1 = scmp.lt.s32.totalorder %s2621_s4, %s2615_s16 }
  0x27   : > { %2474 = vmatpush3.bf16.msra.mxu0 %v2592_v25  ;;  %v627_v25 = vshrl.u32 %v410_v61, 16  ;;  %v680_v35 = vmax.bf16 %v2240_v23, %v512_v7  ;;  %v683_v36 = vmax.bf16 %v2243_v24, %v515_v8  ;;  %v2279_v52 = vrot.slane %v719_v38, 10  ;;  %v1016_v7 = vld [vmem:[%s2839_s5] sm:$0x88]  ;;  %v1019_v8 = vld [vmem:[%s2839_s5 + $0x18] sm:$0x88] }
  0x28   : > { %2475 = vmatprep.subr.bf16.mxu0 %v2594_v27  ;;  %v710_v27 = vld [vmem:[%s2839_s5 + $0x30] sm:$0x44]  ;;  %v2261_v34 = vrot.slane %v642_v26, 9  ;;  %v695_v42 = vmax.bf16 %v2255_v31, %v527_v12  ;;  %v2282_v55 = vrot.slane %v722_v43, 10  ;;  %v2285_v56 = vrot.slane %v725_v44, 10  ;;  %p2617_p12 = pnand %p2616_p11, %p2738_p5  ;;  %p2624_p2 = por %p2623_p1, %p2622_p0 }
  0x29   : > { %2496 = vmatpush3.bf16.msra.mxu1 %v2595_v28  ;;  %v2246_v28 = vrot.slane %v567_v17, 9  ;;  %v2258_v33 = vrot.slane %v627_v25, 9  ;;  %v2270_v49 = vrot.slane %v710_v27, 10  ;;  %v824_v57 = vmax.bf16 %v2264_v47, %v680_v35  ;;  %v1028_v23 = vld [vmem:[%s2839_s5 + $0x60] sm:$0x88] }
  0x2a   : > { %2497 = vmatprep.subr.bf16.mxu1 %v2597_v30  ;;  %v2252_v30 = vrot.slane %v597_v19, 9  ;;  %v701_v46 = vmax.bf16 %v2261_v34, %v533_v14  ;;  %v827_v58 = vmax.bf16 %v2267_v48, %v683_v36  ;;  %v839_v62 = vmax.bf16 %v2279_v52, %v695_v42  ;;  %v1031_v24 = vld [vmem:[%s2839_s5 + $0x78] sm:$0x88]  ;;  %p2618_p13 = pneg %p2617_p12 }
  0x2b   : > { %2476 = vmatpush3.bf16.msra.mxu0 %v2596_v29  ;;  %v2249_v29 = vrot.slane %v582_v18, 9  ;;  %v686_v39 = vmax.bf16 %v2246_v28, %v518_v9  ;;  %v698_v45 = vmax.bf16 %v2258_v33, %v530_v13  ;;  %v849_v1 = vshrl.u32 %v704_v21, 16  ;;  %v1022_v13 = vld [vmem:[%s2839_s5 + $0x30] sm:$0x88]  ;;  %v1025_v18 = vld [vmem:[%s2839_s5 + $0x48] sm:$0x88] }
  0x2c   : > { %v692_v41 = vmax.bf16 %v2252_v30, %v524_v11  ;;  %v845_v0 = vmax.bf16 %v2285_v56, %v701_v46  ;;  %v864_v2 = vshrl.u32 %v707_v22, 16  ;;  %2505 = vmatprep.subr.bf16.mxu0 %v2599_v54  ;;  %v879_v3 = vshrl.u32 %v710_v27, 16  ;;  %v1037_v30 = vld [vmem:[%s2839_s5 + $0xa8] sm:$0x88]  ;;  %p2625_p3 = pnand %p2624_p2, %p2618_p13 }
  0x2d   : > { %v689_v40 = vmax.bf16 %v2249_v29, %v521_v10  ;;  %v830_v59 = vmax.bf16 %v2270_v49, %v686_v39  ;;  %2498 = vmatpush3.bf16.msra.mxu1 %v2598_v53  ;;  %v842_v63 = vmax.bf16 %v2282_v55, %v698_v45  ;;  %v894_v4 = vshrl.u32 %v713_v32, 16  ;;  %v1034_v29 = vld [vmem:[%s2839_s5 + $0x90] sm:$0x88] }
  0x2e   : > { %v836_v61 = vmax.bf16 %v2276_v51, %v692_v41  ;;  %v909_v5 = vshrl.u32 %v716_v37, 16  ;;  %v924_v6 = vshrl.u32 %v719_v38, 16  ;;  %v2288_v9 = vrot.slane %v849_v1, 10 }
  0x2f   : > { %v833_v60 = vmax.bf16 %v2273_v50, %v689_v40  ;;  %v2291_v10 = vrot.slane %v864_v2, 10  ;;  %v939_v11 = vshrl.u32 %v722_v43, 16  ;;  %v954_v12 = vshrl.u32 %v725_v44, 16 }
  0x30   : > { %v2294_v14 = vrot.slane %v879_v3, 10  ;;  %v2297_v15 = vrot.slane %v894_v4, 10  ;;  %v2300_v16 = vrot.slane %v909_v5, 10  ;;  %v2303_v17 = vrot.slane %v924_v6, 10 }
  0x31   : > { %v2306_v19 = vrot.slane %v939_v11, 10  ;;  %v2309_v20 = vrot.slane %v954_v12, 10  ;;  %v992_v21 = vmax.bf16 %v2288_v9, %v824_v57  ;;  %v995_v22 = vmax.bf16 %v2291_v10, %v827_v58 }
  0x32   : > { %v998_v25 = vmax.bf16 %v2294_v14, %v830_v59  ;;  %v1001_v26 = vmax.bf16 %v2297_v15, %v833_v60  ;;  %v1004_v27 = vmax.bf16 %v2300_v16, %v836_v61  ;;  %v1007_v28 = vmax.bf16 %v2303_v17, %v839_v62 }
  0x33   : > { %v1010_v31 = vmax.bf16 %v2306_v19, %v842_v63  ;;  %v1013_v32 = vmax.bf16 %v2309_v20, %v845_v0  ;;  %v2312_v33 = vrot.slane %v1016_v7, 11  ;;  %v2315_v34 = vrot.slane %v1019_v8, 11 }
  0x34   : > { %v2318_v35 = vrot.slane %v1022_v13, 11  ;;  %v2321_v36 = vrot.slane %v1025_v18, 11  ;;  %v2324_v37 = vrot.slane %v1028_v23, 11  ;;  %v2327_v38 = vrot.slane %v1031_v24, 11 }
  0x35   : > { %v2330_v39 = vrot.slane %v1034_v29, 11  ;;  %v2333_v40 = vrot.slane %v1037_v30, 11  ;;  %v1136_v41 = vmax.bf16 %v2312_v33, %v992_v21  ;;  %v1139_v42 = vmax.bf16 %v2315_v34, %v995_v22 }
  0x36   : > { %v1142_v43 = vmax.bf16 %v2318_v35, %v998_v25  ;;  %v1145_v44 = vmax.bf16 %v2321_v36, %v1001_v26  ;;  %v1148_v45 = vmax.bf16 %v2324_v37, %v1004_v27  ;;  %v1151_v46 = vmax.bf16 %v2327_v38, %v1007_v28 }
  0x37   : > { %v1154_v47 = vmax.bf16 %v2330_v39, %v1010_v31  ;;  %v1157_v48 = vmax.bf16 %v2333_v40, %v1013_v32  ;;  %v1161_v49 = vshrl.u32 %v1016_v7, 16  ;;  %v1176_v50 = vshrl.u32 %v1019_v8, 16 }
  0x38   : > { %v1191_v51 = vshrl.u32 %v1022_v13, 16  ;;  %v1206_v52 = vshrl.u32 %v1025_v18, 16  ;;  %v1221_v53 = vshrl.u32 %v1028_v23, 16  ;;  %v1236_v54 = vshrl.u32 %v1031_v24, 16 }
  0x39   : > { %v2336_v55 = vrot.slane %v1161_v49, 11  ;;  %v2339_v56 = vrot.slane %v1176_v50, 11  ;;  %v1251_v57 = vshrl.u32 %v1034_v29, 16  ;;  %v1266_v58 = vshrl.u32 %v1037_v30, 16 }
  0x3a   : > { %v2342_v59 = vrot.slane %v1191_v51, 11  ;;  %v2345_v60 = vrot.slane %v1206_v52, 11  ;;  %v2348_v61 = vrot.slane %v1221_v53, 11  ;;  %v2351_v62 = vrot.slane %v1236_v54, 11  ;;  %v207_v53 = vld [vmem:[%s2839_s5 + $0x38] sm:$0x11] }
  0x3b   : > { %v2354_v63 = vrot.slane %v1251_v57, 11  ;;  %v2357_v0 = vrot.slane %v1266_v58, 11  ;;  %v1304_v1 = vmax.bf16 %v2336_v55, %v1136_v41  ;;  %v1307_v2 = vmax.bf16 %v2339_v56, %v1139_v42  ;;  %v210_v54 = vld [vmem:[%s2839_s5 + $0x50] sm:$0x11]  ;;  %v213_v55 = vld [vmem:[%s2839_s5 + $0x68] sm:$0x11] }
  0x3c   : > { %v1310_v3 = vmax.bf16 %v2342_v59, %v1142_v43  ;;  %v1313_v4 = vmax.bf16 %v2345_v60, %v1145_v44  ;;  %v1316_v5 = vmax.bf16 %v2348_v61, %v1148_v45  ;;  %v1319_v6 = vmax.bf16 %v2351_v62, %v1151_v46  ;;  %v216_v60 = vld [vmem:[%s2839_s5 + $0x80] sm:$0x11]  ;;  %v219_v61 = vld [vmem:[%s2839_s5 + $0x98] sm:$0x11]  ;;  %v222_v62 = vld [vmem:[%s2839_s5 + $0xb0] sm:$0x11] }
  0x3d   : > { %v1322_v7 = vmax.bf16 %v2354_v63, %v1154_v47  ;;  %v1325_v8 = vmax.bf16 %v2357_v0, %v1157_v48  ;;  %v2362_v9 = vcombine.high %v1304_v1, %v1304_v1  ;;  %v2368_v10 = vcombine.high %v1307_v2, %v1307_v2  ;;  %v201_v47 = vld [vmem:[%s2839_s5 + $0x8] sm:$0x11]  ;;  %v204_v48 = vld [vmem:[%s2839_s5 + $0x20] sm:$0x11] }
  0x3e   : > { %v2374_v11 = vcombine.high %v1310_v3, %v1310_v3  ;;  %v2380_v12 = vcombine.high %v1313_v4, %v1313_v4  ;;  %v2386_v13 = vcombine.high %v1316_v5, %v1316_v5  ;;  %v2392_v14 = vcombine.high %v1319_v6, %v1319_v6 }
  0x3f   : > { %v2398_v15 = vcombine.high %v1322_v7, %v1322_v7  ;;  %v2404_v16 = vcombine.high %v1325_v8, %v1325_v8  ;;  %v1552_v17 = vunpack.c.l.b16 %v2362_v9  ;;  %v1558_v18 = vunpack.c.l.b16 %v2368_v10 }
  0x40   : > { %v1564_v19 = vunpack.c.l.b16 %v2374_v11  ;;  %v1570_v20 = vunpack.c.l.b16 %v2380_v12  ;;  %v1576_v21 = vunpack.c.l.b16 %v2386_v13  ;;  %v1582_v22 = vunpack.c.l.b16 %v2392_v14  ;;  %v2903_v11 = vld [vmem:[%s2839_s5 + $0x8] sm:$0x22] }
  0x41   : > { %v1588_v23 = vunpack.c.l.b16 %v2398_v15  ;;  %v1594_v24 = vunpack.c.l.b16 %v2404_v16  ;;  %v1620_v25 = vrot.slane %v1558_v18, 7  ;;  %v2361_v26 = vcombine.low %v1304_v1, %v1304_v1  ;;  %v396_v16 = vld [vmem:[%s2839_s5 + $0x20] sm:$0x22]  ;;  %v402_v18 = vld [vmem:[%s2839_s5 + $0x50] sm:$0x22] }
  0x42   : > { %v1622_v27 = vrot.slane %v1564_v19, 6  ;;  %v1624_v28 = vrot.slane %v1570_v20, 5  ;;  %v1626_v29 = vrot.slane %v1576_v21, 4  ;;  %v1628_v30 = vrot.slane %v1582_v22, 3 }
  0x43   : > { %v1621_v31 = vsel %vm1600_vm0, %v1620_v25, %v1552_v17  ;;  %v1630_v32 = vrot.slane %v1588_v23, 2  ;;  %v1632_v33 = vrot.slane %v1594_v24, 1  ;;  %v2367_v34 = vcombine.low %v1307_v2, %v1307_v2  ;;  %v399_v17 = vld [vmem:[%s2839_s5 + $0x38] sm:$0x22] }
  0x44   : > { %v1623_v35 = vsel %vm1603_vm1, %v1622_v27, %v1621_v31  ;;  %v2373_v36 = vcombine.low %v1310_v3, %v1310_v3  ;;  %v2379_v37 = vcombine.low %v1313_v4, %v1313_v4  ;;  %v2385_v38 = vcombine.low %v1316_v5, %v1316_v5  ;;  %v405_v27 = vld [vmem:[%s2839_s5 + $0x68] sm:$0x22] }
  0x45   : > { %v1625_v39 = vsel %vm1606_vm2, %v1624_v28, %v1623_v35  ;;  %v2391_v40 = vcombine.low %v1319_v6, %v1319_v6  ;;  %v2397_v41 = vcombine.low %v1322_v7, %v1322_v7  ;;  %v2403_v42 = vcombine.low %v1325_v8, %v1325_v8 }
  0x46   : > { %v1627_v43 = vsel %vm1609_vm3, %v1626_v29, %v1625_v39  ;;  %v1551_v44 = vunpack.c.l.b16 %v2361_v26  ;;  %v1557_v45 = vunpack.c.l.b16 %v2367_v34  ;;  %v1563_v46 = vunpack.c.l.b16 %v2373_v36  ;;  %v414_v34 = vld [vmem:[%s2839_s5 + $0xb0] sm:$0x22]  ;;  %v2600_v36 = vld [vmem:[%s3091_s1 + $0x100] sm:$0xff]  }
  0x47   : > { %v1629_v49 = vsel %vm1612_vm4, %v1628_v30, %v1627_v43  ;;  %v1569_v50 = vunpack.c.l.b16 %v2379_v37  ;;  %v1575_v51 = vunpack.c.l.b16 %v2385_v38  ;;  %v1581_v52 = vunpack.c.l.b16 %v2391_v40 }
  0x48   : > { %v1631_v56 = vsel %vm1615_vm5, %v1630_v32, %v1629_v49  ;;  %v1587_v57 = vunpack.c.l.b16 %v2397_v41  ;;  %v1593_v58 = vunpack.c.l.b16 %v2403_v42  ;;  %v1599_v59 = vrot.slane %v1557_v45, 7  ;;  %v408_v32 = vld [vmem:[%s2839_s5 + $0x80] sm:$0x22] }
  0x49   : > { %v1633_v63 = vsel %vm1618_vm6, %v1632_v33, %v1631_v56  ;;  %v1602_v0 = vrot.slane %v1563_v46, 6  ;;  %v1605_v1 = vrot.slane %v1569_v50, 5  ;;  %v1608_v2 = vrot.slane %v1575_v51, 4  ;;  %v411_v33 = vld [vmem:[%s2839_s5 + $0x98] sm:$0x22] }
  0x4a   : > { %v1691_v3 = vpack.c.b16 %v1633_v63, %v1633_v63  ;;  %v1601_v4 = vsel %vm1600_vm0, %v1599_v59, %v1551_v44  ;;  %v1611_v5 = vrot.slane %v1581_v52, 3  ;;  %v1614_v6 = vrot.slane %v1587_v57, 2  ;;  %v2601_v44 = vld [vmem:[%s3091_s1 + $0x148] sm:$0xff]  }
  0x4b   : > { %v1604_v7 = vsel %vm1603_vm1, %v1602_v0, %v1601_v4  ;;  %v1617_v8 = vrot.slane %v1593_v58, 1  ;;  %v230_v9 = vshrl.u32 %v201_v47, 16  ;;  %v245_v10 = vshrl.u32 %v204_v48, 16  ;;  %v2602_v57 = vld [vmem:[%s3091_s1 + $0x108] sm:$0xff]   ;;  %v708_v4 = vld [vmem:[%s2839_s5 + $0x20] sm:$0x44] }
  0x4c   : > { %2022 = vmatprep.mubr.bf16.mxu0 %v1691_v3  ;;  %v1607_v12 = vsel %vm1606_vm2, %v1605_v1, %v1604_v7  ;;  %v260_v13 = vshrl.u32 %v207_v53, 16  ;;  %v275_v14 = vshrl.u32 %v210_v54, 16  ;;  %v290_v15 = vshrl.u32 %v213_v55, 16  ;;  %v705_v3 = vld [vmem:[%s2839_s5 + $0x8] sm:$0x44] }
  0x4d   : > { %v1610_v19 = vsel %vm1609_vm3, %v1608_v2, %v1607_v12  ;;  %v305_v20 = vshrl.u32 %v216_v60, 16  ;;  %v320_v21 = vshrl.u32 %v219_v61, 16  ;;  %v335_v22 = vshrl.u32 %v222_v62, 16  ;;  %v720_v12 = vld [vmem:[%s2839_s5 + $0x80] sm:$0x44] }
  0x4e   : > { %v1613_v23 = vsel %vm1612_vm4, %v1611_v5, %v1610_v19  ;;  %v369_v24 = vmax.bf16 %v230_v9, %v201_v47  ;;  %v372_v25 = vmax.bf16 %v245_v10, %v204_v48  ;;  %v375_v26 = vmax.bf16 %v260_v13, %v207_v53  ;;  %v711_v5 = vld [vmem:[%s2839_s5 + $0x38] sm:$0x44] }
  0x4f   : > { %v1616_v28 = vsel %vm1615_vm5, %v1614_v6, %v1613_v23  ;;  %v378_v29 = vmax.bf16 %v275_v14, %v210_v54  ;;  %v381_v30 = vmax.bf16 %v290_v15, %v213_v55  ;;  %v384_v31 = vmax.bf16 %v305_v20, %v216_v60  ;;  %v714_v6 = vld [vmem:[%s2839_s5 + $0x50] sm:$0x44] }
  0x50   : > { %v1619_v35 = vsel %vm1618_vm6, %v1617_v8, %v1616_v28  ;;  %v387_v37 = vmax.bf16 %v320_v21, %v219_v61  ;;  %v390_v38 = vmax.bf16 %v335_v22, %v222_v62  ;;  %v2217_v39 = vrot.slane %v2903_v11, 9  ;;  %v2603_v62 = vld [vmem:[%s3091_s1 + $0x150] sm:$0xff]   ;;  %v723_v22 = vld [vmem:[%s2839_s5 + $0x98] sm:$0x44] }
  0x51   : > { %v1690_v40 = vpack.c.b16 %v1619_v35, %v1619_v35  ;;  %v2220_v41 = vrot.slane %v396_v16, 9  ;;  %v2223_v42 = vrot.slane %v399_v17, 9  ;;  %v2226_v43 = vrot.slane %v402_v18, 9  ;;  %v726_v23 = vld [vmem:[%s2839_s5 + $0xb0] sm:$0x44] }
  0x52   : > { %v2229_v45 = vrot.slane %v405_v27, 9  ;;  %v2232_v46 = vrot.slane %v408_v32, 9  ;;  %v2235_v47 = vrot.slane %v411_v33, 9  ;;  %v2238_v48 = vrot.slane %v414_v34, 9 }
  0x53   : > { %2023 = vmatmul.mubr.bf16.vlgmr.msra.gmra.mrb[0].mxu0 %v1690_v40  ;;  %v513_v49 = vmax.bf16 %v2217_v39, %v369_v24  ;;  %v516_v50 = vmax.bf16 %v2220_v41, %v372_v25  ;;  %v519_v51 = vmax.bf16 %v2223_v42, %v375_v26  ;;  %v522_v52 = vmax.bf16 %v2226_v43, %v378_v29  ;;  %v2605_v24 = vld [vmem:[%s3091_s1 + $0x158] sm:$0xff]   ;;  %v2607_v42 = vld [vmem:[%s3091_s1 + $0x160] sm:$0xff]  }
  0x54   : > { %2506 = vmatpush3.bf16.msra.mxu0 %v2600_v36  ;;  %v525_v53 = vmax.bf16 %v2229_v45, %v381_v30  ;;  %v528_v54 = vmax.bf16 %v2232_v46, %v384_v31  ;;  %v531_v55 = vmax.bf16 %v2235_v47, %v387_v37  ;;  %v534_v56 = vmax.bf16 %v2238_v48, %v390_v38  ;;  %v2606_v37 = vld [vmem:[%s3091_s1 + $0x118] sm:$0xff]  }
  0x55   : > { %v542_v58 = vshrl.u32 %v2903_v11, 16  ;;  %v557_v59 = vshrl.u32 %v396_v16, 16  ;;  %v572_v60 = vshrl.u32 %v399_v17, 16  ;;  %v587_v61 = vshrl.u32 %v402_v18, 16  ;;  %2507 = vmatprep.subr.bf16.mxu0 %v2601_v44  ;;  %v717_v11 = vld [vmem:[%s2839_s5 + $0x68] sm:$0x44] }
  0x56   : > { %v602_v63 = vshrl.u32 %v405_v27, 16  ;;  %v617_v0 = vshrl.u32 %v408_v32, 16  ;;  %v632_v1 = vshrl.u32 %v411_v33, 16  ;;  %v647_v2 = vshrl.u32 %v414_v34, 16  ;;  %v2604_v17 = vld [vmem:[%s3091_s1 + $0x110] sm:$0xff]  }
  0x57   : > { %v2241_v7 = vrot.slane %v542_v58, 9  ;;  %v2244_v8 = vrot.slane %v557_v59, 9  ;;  %v2247_v9 = vrot.slane %v572_v60, 9  ;;  %v2250_v10 = vrot.slane %v587_v61, 9  ;;  %v1026_v58 = vld [vmem:[%s2839_s5 + $0x50] sm:$0x88] }
  0x58   : > { %v2253_v13 = vrot.slane %v602_v63, 9  ;;  %v2256_v14 = vrot.slane %v617_v0, 9  ;;  %v2259_v15 = vrot.slane %v632_v1, 9  ;;  %v2262_v16 = vrot.slane %v647_v2, 9  ;;  %2508 = vmatpush3.bf16.msra.mxu0 %v2602_v57  ;;  %v1023_v57 = vld [vmem:[%s2839_s5 + $0x38] sm:$0x88] }
  0x59   : > { %v681_v18 = vmax.bf16 %v2241_v7, %v513_v49  ;;  %v684_v19 = vmax.bf16 %v2244_v8, %v516_v50  ;;  %v687_v20 = vmax.bf16 %v2247_v9, %v519_v51  ;;  %v690_v21 = vmax.bf16 %v2250_v10, %v522_v52  ;;  %2509 = vmatprep.subr.bf16.mxu0 %v2603_v62  ;;  %v2608_v59 = vld [vmem:[%s3091_s1 + $0x120] sm:$0xff]   ;;  %v2609_v0 = vld [vmem:[%s3091_s1 + $0x168] sm:$0xff]  }
  0x5a   : > { %v693_v25 = vmax.bf16 %v2253_v13, %v525_v53  ;;  %v696_v26 = vmax.bf16 %v2256_v14, %v528_v54  ;;  %v699_v27 = vmax.bf16 %v2259_v15, %v531_v55  ;;  %v702_v28 = vmax.bf16 %v2262_v16, %v534_v56  ;;  %v1017_v55 = vld [vmem:[%s2839_s5 + $0x8] sm:$0x88]  ;;  %v1020_v56 = vld [vmem:[%s2839_s5 + $0x20] sm:$0x88] }
  0x5b   : > { %v2265_v29 = vrot.slane %v705_v3, 10  ;;  %v2268_v30 = vrot.slane %v708_v4, 10  ;;  %v2271_v31 = vrot.slane %v711_v5, 10  ;;  %v2274_v32 = vrot.slane %v714_v6, 10  ;;  %v1032_v10 = vld [vmem:[%s2839_s5 + $0x80] sm:$0x88] }
  0x5c   : > { %v2277_v33 = vrot.slane %v717_v11, 10  ;;  %v2280_v34 = vrot.slane %v720_v12, 10  ;;  %v2283_v35 = vrot.slane %v723_v22, 10  ;;  %v2286_v36 = vrot.slane %v726_v23, 10  ;;  %2510 = vmatpush3.bf16.msra.mxu0 %v2604_v17  ;;  %v2610_v17 = vld [vmem:[%s3091_s1 + $0x128] sm:$0xff]  }
  0x5d   : > { %v825_v38 = vmax.bf16 %v2265_v29, %v681_v18  ;;  %v828_v39 = vmax.bf16 %v2268_v30, %v684_v19  ;;  %v831_v40 = vmax.bf16 %v2271_v31, %v687_v20  ;;  %v834_v41 = vmax.bf16 %v2274_v32, %v690_v21  ;;  %2511 = vmatprep.subr.bf16.mxu0 %v2605_v24 }
  0x5e   : > { %v837_v43 = vmax.bf16 %v2277_v33, %v693_v25  ;;  %v840_v44 = vmax.bf16 %v2280_v34, %v696_v26  ;;  %v843_v45 = vmax.bf16 %v2283_v35, %v699_v27  ;;  %v846_v46 = vmax.bf16 %v2286_v36, %v702_v28  ;;  %v2612_v35 = vld [vmem:[%s3091_s1 + $0x130] sm:$0xff]  }
  0x5f   : > { %v854_v47 = vshrl.u32 %v705_v3, 16  ;;  %v869_v48 = vshrl.u32 %v708_v4, 16  ;;  %v884_v49 = vshrl.u32 %v711_v5, 16  ;;  %v899_v50 = vshrl.u32 %v714_v6, 16  ;;  %v1029_v5 = vld [vmem:[%s2839_s5 + $0x68] sm:$0x88] }
  0x60   : > { %v914_v51 = vshrl.u32 %v717_v11, 16  ;;  %v929_v52 = vshrl.u32 %v720_v12, 16  ;;  %v944_v53 = vshrl.u32 %v723_v22, 16  ;;  %v959_v54 = vshrl.u32 %v726_v23, 16  ;;  %2512 = vmatpush3.bf16.msra.mxu0 %v2606_v37  ;;  %v1035_v11 = vld [vmem:[%s2839_s5 + $0x98] sm:$0x88] }
  0x61   : > { %v2289_v60 = vrot.slane %v854_v47, 10  ;;  %v2292_v61 = vrot.slane %v869_v48, 10  ;;  %v2295_v62 = vrot.slane %v884_v49, 10  ;;  %v2298_v63 = vrot.slane %v899_v50, 10  ;;  %2513 = vmatprep.subr.bf16.mxu0 %v2607_v42  ;;  %v1038_v12 = vld [vmem:[%s2839_s5 + $0xb0] sm:$0x88] }
  0x62   : > { %v2301_v1 = vrot.slane %v914_v51, 10  ;;  %v2304_v2 = vrot.slane %v929_v52, 10  ;;  %v2307_v3 = vrot.slane %v944_v53, 10  ;;  %v2310_v4 = vrot.slane %v959_v54, 10  ;;  %v2611_v22 = vld [vmem:[%s3091_s1 + $0x170] sm:$0xff]   ;;  %v2614_v53 = vld [vmem:[%s3091_s1 + $0x138] sm:$0xff]  }
  0x63   : > { %v993_v6 = vmax.bf16 %v2289_v60, %v825_v38  ;;  %v996_v7 = vmax.bf16 %v2292_v61, %v828_v39  ;;  %v999_v8 = vmax.bf16 %v2295_v62, %v831_v40  ;;  %v1002_v9 = vmax.bf16 %v2298_v63, %v834_v41  ;;  %v2613_v40 = vld [vmem:[%s3091_s1 + $0x178] sm:$0xff]  }
  0x64   : > { %v1005_v13 = vmax.bf16 %v2301_v1, %v837_v43  ;;  %v1008_v14 = vmax.bf16 %v2304_v2, %v840_v44  ;;  %v1011_v15 = vmax.bf16 %v2307_v3, %v843_v45  ;;  %v1014_v16 = vmax.bf16 %v2310_v4, %v846_v46  ;;  %2514 = vmatpush3.bf16.msra.mxu0 %v2608_v59 }
  0x65   : > { %v2313_v18 = vrot.slane %v1017_v55, 11  ;;  %v2316_v19 = vrot.slane %v1020_v56, 11  ;;  %v2319_v20 = vrot.slane %v1023_v57, 11  ;;  %v2322_v21 = vrot.slane %v1026_v58, 11  ;;  %2515 = vmatprep.subr.bf16.mxu0 %v2609_v0 }
  0x66   : > { %v2325_v23 = vrot.slane %v1029_v5, 11  ;;  %v2328_v24 = vrot.slane %v1032_v10, 11  ;;  %v2331_v25 = vrot.slane %v1035_v11, 11  ;;  %v2334_v26 = vrot.slane %v1038_v12, 11 }
  0x67   : > { %v1137_v27 = vmax.bf16 %v2313_v18, %v993_v6  ;;  %v1140_v28 = vmax.bf16 %v2316_v19, %v996_v7  ;;  %v1143_v29 = vmax.bf16 %v2319_v20, %v999_v8  ;;  %v1146_v30 = vmax.bf16 %v2322_v21, %v1002_v9 }
  0x68   : > { %v1149_v31 = vmax.bf16 %v2325_v23, %v1005_v13  ;;  %v1152_v32 = vmax.bf16 %v2328_v24, %v1008_v14  ;;  %v1155_v33 = vmax.bf16 %v2331_v25, %v1011_v15  ;;  %v1158_v34 = vmax.bf16 %v2334_v26, %v1014_v16  ;;  %2516 = vmatpush3.bf16.msra.mxu0 %v2610_v17 }
  0x69   : > { %v1166_v36 = vshrl.u32 %v1017_v55, 16  ;;  %v1181_v37 = vshrl.u32 %v1020_v56, 16  ;;  %v1196_v38 = vshrl.u32 %v1023_v57, 16  ;;  %v1211_v39 = vshrl.u32 %v1026_v58, 16  ;;  %2517 = vmatprep.subr.bf16.mxu0 %v2611_v22 }
  0x6a   : > { %v1226_v41 = vshrl.u32 %v1029_v5, 16  ;;  %v1241_v42 = vshrl.u32 %v1032_v10, 16  ;;  %v1256_v43 = vshrl.u32 %v1035_v11, 16  ;;  %v1271_v44 = vshrl.u32 %v1038_v12, 16 }
  0x6b   : > { %v2337_v45 = vrot.slane %v1166_v36, 11  ;;  %v2340_v46 = vrot.slane %v1181_v37, 11  ;;  %v2343_v47 = vrot.slane %v1196_v38, 11  ;;  %v2346_v48 = vrot.slane %v1211_v39, 11  ;;  %v202_v38 = vld [vmem:[%s2839_s5 + $0x10] sm:$0x11] }
  0x6c   : > { %v2349_v49 = vrot.slane %v1226_v41, 11  ;;  %v2352_v50 = vrot.slane %v1241_v42, 11  ;;  %v2355_v51 = vrot.slane %v1256_v43, 11  ;;  %v2358_v52 = vrot.slane %v1271_v44, 11  ;;  %2518 = vmatpush3.bf16.msra.mxu0 %v2612_v35  ;;  %v205_v39 = vld [vmem:[%s2839_s5 + $0x28] sm:$0x11] }
  0x6d   : > { %v1305_v54 = vmax.bf16 %v2337_v45, %v1137_v27  ;;  %v1308_v55 = vmax.bf16 %v2340_v46, %v1140_v28  ;;  %v1311_v56 = vmax.bf16 %v2343_v47, %v1143_v29  ;;  %v1314_v57 = vmax.bf16 %v2346_v48, %v1146_v30  ;;  %2519 = vmatprep.subr.bf16.mxu0 %v2613_v40  ;;  %v208_v44 = vld [vmem:[%s2839_s5 + $0x40] sm:$0x11]  ;;  %v211_v45 = vld [vmem:[%s2839_s5 + $0x58] sm:$0x11]  ;;  %v214_v46 = vld [vmem:[%s2839_s5 + $0x70] sm:$0x11] }
  0x6e   : > { %v1317_v58 = vmax.bf16 %v2349_v49, %v1149_v31  ;;  %v1320_v59 = vmax.bf16 %v2352_v50, %v1152_v32  ;;  %v1323_v60 = vmax.bf16 %v2355_v51, %v1155_v33  ;;  %v1326_v61 = vmax.bf16 %v2358_v52, %v1158_v34  ;;  %v217_v51 = vld [vmem:[%s2839_s5 + $0x88] sm:$0x11] }
  0x6f   : > { %v2364_v62 = vcombine.high %v1305_v54, %v1305_v54  ;;  %v2370_v63 = vcombine.high %v1308_v55, %v1308_v55  ;;  %v2376_v0 = vcombine.high %v1311_v56, %v1311_v56  ;;  %v2382_v1 = vcombine.high %v1314_v57, %v1314_v57 }
  0x70   : > { %v2388_v2 = vcombine.high %v1317_v58, %v1317_v58  ;;  %v2394_v3 = vcombine.high %v1320_v59, %v1320_v59  ;;  %v2400_v4 = vcombine.high %v1323_v60, %v1323_v60  ;;  %v2406_v5 = vcombine.high %v1326_v61, %v1326_v61  ;;  %2520 = vmatpush3.bf16.msra.mxu0 %v2614_v53 }
  0x71   : > { %v1554_v6 = vunpack.c.l.b16 %v2364_v62  ;;  %v1560_v7 = vunpack.c.l.b16 %v2370_v63  ;;  %v1566_v8 = vunpack.c.l.b16 %v2376_v0  ;;  %v1572_v9 = vunpack.c.l.b16 %v2382_v1 }
  0x72   : > { %v1578_v10 = vunpack.c.l.b16 %v2388_v2  ;;  %v1584_v11 = vunpack.c.l.b16 %v2394_v3  ;;  %v1590_v12 = vunpack.c.l.b16 %v2400_v4  ;;  %v1596_v13 = vunpack.c.l.b16 %v2406_v5 }
  0x73   : > { %v1648_v14 = vrot.slane %v1560_v7, 7  ;;  %v1650_v15 = vrot.slane %v1566_v8, 6  ;;  %v1652_v16 = vrot.slane %v1572_v9, 5  ;;  %v2363_v17 = vcombine.low %v1305_v54, %v1305_v54 }
  0x74   : > { %v1654_v18 = vrot.slane %v1578_v10, 4  ;;  %v1656_v19 = vrot.slane %v1584_v11, 3  ;;  %v1658_v20 = vrot.slane %v1590_v12, 2  ;;  %v1660_v21 = vrot.slane %v1596_v13, 1  ;;  %v397_v11 = vld [vmem:[%s2839_s5 + $0x28] sm:$0x22] }
  0x75   : > { %v1649_v22 = vsel %vm1600_vm0, %v1648_v14, %v1554_v6  ;;  %v2369_v23 = vcombine.low %v1308_v55, %v1308_v55  ;;  %v2375_v24 = vcombine.low %v1311_v56, %v1311_v56  ;;  %v2381_v25 = vcombine.low %v1314_v57, %v1314_v57  ;;  %v220_v56 = vld [vmem:[%s2839_s5 + $0xa0] sm:$0x11]  ;;  %v394_v6 = vld [vmem:[%s2839_s5 + $0x10] sm:$0x22]  ;;  %v400_v12 = vld [vmem:[%s2839_s5 + $0x40] sm:$0x22] }
  0x76   : > { %v1651_v26 = vsel %vm1603_vm1, %v1650_v15, %v1649_v22  ;;  %v2387_v27 = vcombine.low %v1317_v58, %v1317_v58  ;;  %v2393_v28 = vcombine.low %v1320_v59, %v1320_v59  ;;  %v2399_v29 = vcombine.low %v1323_v60, %v1323_v60  ;;  %v223_v60 = vld [vmem:[%s2839_s5 + $0xb8] sm:$0x11] }
  0x77   : > { %v1653_v30 = vsel %vm1606_vm2, %v1652_v16, %v1651_v26  ;;  %v2405_v31 = vcombine.low %v1326_v61, %v1326_v61  ;;  %v1553_v32 = vunpack.c.l.b16 %v2363_v17  ;;  %v1559_v33 = vunpack.c.l.b16 %v2369_v23  ;;  %v403_v17 = vld [vmem:[%s2839_s5 + $0x58] sm:$0x22] }
  0x78   : > { %v1655_v34 = vsel %vm1609_vm3, %v1654_v18, %v1653_v30  ;;  %v1565_v35 = vunpack.c.l.b16 %v2375_v24  ;;  %v1571_v36 = vunpack.c.l.b16 %v2381_v25  ;;  %v1577_v37 = vunpack.c.l.b16 %v2387_v27  ;;  %v406_v18 = vld [vmem:[%s2839_s5 + $0x70] sm:$0x22]  ;;  %v412_v24 = vld [vmem:[%s2839_s5 + $0xa0] sm:$0x22]  ;;  %v415_v25 = vld [vmem:[%s2839_s5 + $0xb8] sm:$0x22] }
  0x79   : > { %v1657_v40 = vsel %vm1612_vm4, %v1656_v19, %v1655_v34  ;;  %v1583_v41 = vunpack.c.l.b16 %v2393_v28  ;;  %v1589_v42 = vunpack.c.l.b16 %v2399_v29  ;;  %v1595_v43 = vunpack.c.l.b16 %v2405_v31  ;;  %v409_v19 = vld [vmem:[%s2839_s5 + $0x88] sm:$0x22] }
  0x7a   : > { %v1659_v47 = vsel %vm1615_vm5, %v1658_v20, %v1657_v40  ;;  %v1634_v48 = vrot.slane %v1559_v33, 7  ;;  %v1636_v49 = vrot.slane %v1565_v35, 6  ;;  %v1638_v50 = vrot.slane %v1571_v36, 5 }
  0x7b   : > { %v1661_v52 = vsel %vm1618_vm6, %v1660_v21, %v1659_v47  ;;  %v1640_v53 = vrot.slane %v1577_v37, 4  ;;  %v1642_v54 = vrot.slane %v1583_v41, 3  ;;  %v1644_v55 = vrot.slane %v1589_v42, 2 }
  0x7c   : > { %v1693_v57 = vpack.c.b16 %v1661_v52, %v1661_v52  ;;  %v1635_v58 = vsel %vm1600_vm0, %v1634_v48, %v1553_v32  ;;  %v1646_v59 = vrot.slane %v1595_v43, 1  ;;  %v235_v61 = vshrl.u32 %v202_v38, 16 }
  0x7d   : > { %v1637_v62 = vsel %vm1603_vm1, %v1636_v49, %v1635_v58  ;;  %v250_v63 = vshrl.u32 %v205_v39, 16  ;;  %v265_v0 = vshrl.u32 %v208_v44, 16  ;;  %v280_v1 = vshrl.u32 %v211_v45, 16 }
  0x7e   : > { %2062 = vmatprep.mubr.bf16.mxu1 %v1693_v57  ;;  %v1639_v2 = vsel %vm1606_vm2, %v1638_v50, %v1637_v62  ;;  %v295_v3 = vshrl.u32 %v214_v46, 16  ;;  %v310_v4 = vshrl.u32 %v217_v51, 16  ;;  %v325_v5 = vshrl.u32 %v220_v56, 16  ;;  %v706_v50 = vld [vmem:[%s2839_s5 + $0x10] sm:$0x44] }
  0x7f   : > { %v1641_v7 = vsel %vm1609_vm3, %v1640_v53, %v1639_v2  ;;  %v340_v8 = vshrl.u32 %v223_v60, 16  ;;  %v370_v9 = vmax.bf16 %v235_v61, %v202_v38  ;;  %v373_v10 = vmax.bf16 %v250_v63, %v205_v39  ;;  %v715_v61 = vld [vmem:[%s2839_s5 + $0x58] sm:$0x44]  ;;  %v718_v2 = vld [vmem:[%s2839_s5 + $0x70] sm:$0x44] }
  0x80   : > { %v1643_v13 = vsel %vm1612_vm4, %v1642_v54, %v1641_v7  ;;  %v376_v14 = vmax.bf16 %v265_v0, %v208_v44  ;;  %v379_v15 = vmax.bf16 %v280_v1, %v211_v45  ;;  %v382_v16 = vmax.bf16 %v295_v3, %v214_v46  ;;  %v721_v3 = vld [vmem:[%s2839_s5 + $0x88] sm:$0x44] }
  0x81   : > { %v1645_v20 = vsel %vm1615_vm5, %v1644_v55, %v1643_v13  ;;  %v385_v21 = vmax.bf16 %v310_v4, %v217_v51  ;;  %v388_v22 = vmax.bf16 %v325_v5, %v220_v56  ;;  %v391_v23 = vmax.bf16 %v340_v8, %v223_v60  ;;  %v709_v51 = vld [vmem:[%s2839_s5 + $0x28] sm:$0x44]  ;;  %v712_v56 = vld [vmem:[%s2839_s5 + $0x40] sm:$0x44] }
  0x82   : > { %v1647_v26 = vsel %vm1618_vm6, %v1646_v59, %v1645_v20  ;;  %v2218_v27 = vrot.slane %v394_v6, 9  ;;  %v2221_v28 = vrot.slane %v397_v11, 9  ;;  %v2224_v29 = vrot.slane %v400_v12, 9  ;;  %v724_v8 = vld [vmem:[%s2839_s5 + $0xa0] sm:$0x44] }
  0x83   : > { %v1692_v30 = vpack.c.b16 %v1647_v26, %v1647_v26  ;;  %v2227_v31 = vrot.slane %v403_v17, 9  ;;  %v2230_v32 = vrot.slane %v406_v18, 9  ;;  %v2233_v33 = vrot.slane %v409_v19, 9 }
  0x84   : > { %v2236_v34 = vrot.slane %v412_v24, 9  ;;  %v2239_v35 = vrot.slane %v415_v25, 9  ;;  %v514_v36 = vmax.bf16 %v2218_v27, %v370_v9  ;;  %v517_v37 = vmax.bf16 %v2221_v28, %v373_v10  ;;  %v727_v9 = vld [vmem:[%s2839_s5 + $0xb8] sm:$0x44] }
  0x85   : > { %2063 = vmatmul.mubr.bf16.vlgmr.msra.gmra.mrb[0].mxu1 %v1692_v30  ;;  %v520_v38 = vmax.bf16 %v2224_v29, %v376_v14  ;;  %v523_v39 = vmax.bf16 %v2227_v31, %v379_v15  ;;  %v526_v40 = vmax.bf16 %v2230_v32, %v382_v16  ;;  %v529_v41 = vmax.bf16 %v2233_v33, %v385_v21 }
  0x86   : > { %v532_v42 = vmax.bf16 %v2236_v34, %v388_v22  ;;  %v535_v43 = vmax.bf16 %v2239_v35, %v391_v23  ;;  %v547_v44 = vshrl.u32 %v394_v6, 16  ;;  %v562_v45 = vshrl.u32 %v397_v11, 16  ;;  %v1018_v34 = vld [vmem:[%s2839_s5 + $0x10] sm:$0x88]  ;;  %v1021_v35 = vld [vmem:[%s2839_s5 + $0x28] sm:$0x88] }
  0x87   : > { %v577_v46 = vshrl.u32 %v400_v12, 16  ;;  %v592_v47 = vshrl.u32 %v403_v17, 16  ;;  %v607_v48 = vshrl.u32 %v406_v18, 16  ;;  %v622_v49 = vshrl.u32 %v409_v19, 16 }
  0x88   : > { %v2242_v52 = vrot.slane %v547_v44, 9  ;;  %v2245_v53 = vrot.slane %v562_v45, 9  ;;  %v637_v54 = vshrl.u32 %v412_v24, 16  ;;  %v652_v55 = vshrl.u32 %v415_v25, 16  ;;  %v1027_v45 = vld [vmem:[%s2839_s5 + $0x58] sm:$0x88] }
  0x89   : > { %v2248_v57 = vrot.slane %v577_v46, 9  ;;  %v2251_v58 = vrot.slane %v592_v47, 9  ;;  %v2254_v59 = vrot.slane %v607_v48, 9  ;;  %v2257_v60 = vrot.slane %v622_v49, 9 }
  0x8a   : > { %v2260_v62 = vrot.slane %v637_v54, 9  ;;  %v2263_v63 = vrot.slane %v652_v55, 9  ;;  %v682_v0 = vmax.bf16 %v2242_v52, %v514_v36  ;;  %v685_v1 = vmax.bf16 %v2245_v53, %v517_v37 }
  0x8b   : > { %v688_v4 = vmax.bf16 %v2248_v57, %v520_v38  ;;  %v691_v5 = vmax.bf16 %v2251_v58, %v523_v39  ;;  %v694_v6 = vmax.bf16 %v2254_v59, %v526_v40  ;;  %v697_v7 = vmax.bf16 %v2257_v60, %v529_v41  ;;  %v1024_v40 = vld [vmem:[%s2839_s5 + $0x40] sm:$0x88]  ;;  %v1039_v57 = vld [vmem:[%s2839_s5 + $0xb8] sm:$0x88] }
  0x8c   : > { %v700_v10 = vmax.bf16 %v2260_v62, %v532_v42  ;;  %v703_v11 = vmax.bf16 %v2263_v63, %v535_v43  ;;  %v2266_v12 = vrot.slane %v706_v50, 10  ;;  %v2269_v13 = vrot.slane %v709_v51, 10 }
  0x8d   : > { %v2272_v14 = vrot.slane %v712_v56, 10  ;;  %v2275_v15 = vrot.slane %v715_v61, 10  ;;  %v2278_v16 = vrot.slane %v718_v2, 10  ;;  %v2281_v17 = vrot.slane %v721_v3, 10 }
  0x8e   : > { %v2284_v18 = vrot.slane %v724_v8, 10  ;;  %v2287_v19 = vrot.slane %v727_v9, 10  ;;  %v826_v20 = vmax.bf16 %v2266_v12, %v682_v0  ;;  %v829_v21 = vmax.bf16 %v2269_v13, %v685_v1 }
  0x8f   : > { %v832_v22 = vmax.bf16 %v2272_v14, %v688_v4  ;;  %v835_v23 = vmax.bf16 %v2275_v15, %v691_v5  ;;  %v838_v24 = vmax.bf16 %v2278_v16, %v694_v6  ;;  %v841_v25 = vmax.bf16 %v2281_v17, %v697_v7 }
  0x90   : > { %v844_v26 = vmax.bf16 %v2284_v18, %v700_v10  ;;  %v847_v27 = vmax.bf16 %v2287_v19, %v703_v11  ;;  %v859_v28 = vshrl.u32 %v706_v50, 16  ;;  %v874_v29 = vshrl.u32 %v709_v51, 16  ;;  %v1030_v50 = vld [vmem:[%s2839_s5 + $0x70] sm:$0x88]  ;;  %v1033_v51 = vld [vmem:[%s2839_s5 + $0x88] sm:$0x88] }
  0x91   : > { %v889_v30 = vshrl.u32 %v712_v56, 16  ;;  %v904_v31 = vshrl.u32 %v715_v61, 16  ;;  %v919_v32 = vshrl.u32 %v718_v2, 16  ;;  %v934_v33 = vshrl.u32 %v721_v3, 16  ;;  %v1036_v56 = vld [vmem:[%s2839_s5 + $0xa0] sm:$0x88] }
  0x92   : > { %v2290_v36 = vrot.slane %v859_v28, 10  ;;  %v2293_v37 = vrot.slane %v874_v29, 10  ;;  %v949_v38 = vshrl.u32 %v724_v8, 16  ;;  %v964_v39 = vshrl.u32 %v727_v9, 16 }
  0x93   : > { %v2296_v41 = vrot.slane %v889_v30, 10  ;;  %v2299_v42 = vrot.slane %v904_v31, 10  ;;  %v2302_v43 = vrot.slane %v919_v32, 10  ;;  %v2305_v44 = vrot.slane %v934_v33, 10 }
  0x94   : > { %v2308_v46 = vrot.slane %v949_v38, 10  ;;  %v2311_v47 = vrot.slane %v964_v39, 10  ;;  %v994_v48 = vmax.bf16 %v2290_v36, %v826_v20  ;;  %v997_v49 = vmax.bf16 %v2293_v37, %v829_v21 }
  0x95   : > { %v1000_v52 = vmax.bf16 %v2296_v41, %v832_v22  ;;  %v1003_v53 = vmax.bf16 %v2299_v42, %v835_v23  ;;  %v1006_v54 = vmax.bf16 %v2302_v43, %v838_v24  ;;  %v1009_v55 = vmax.bf16 %v2305_v44, %v841_v25 }
  0x96   : > { %v1012_v58 = vmax.bf16 %v2308_v46, %v844_v26  ;;  %v1015_v59 = vmax.bf16 %v2311_v47, %v847_v27  ;;  %v2314_v60 = vrot.slane %v1018_v34, 11  ;;  %v2317_v61 = vrot.slane %v1021_v35, 11 }
  0x97   : > { %v2320_v62 = vrot.slane %v1024_v40, 11  ;;  %v2323_v63 = vrot.slane %v1027_v45, 11  ;;  %v2326_v0 = vrot.slane %v1030_v50, 11  ;;  %v2329_v1 = vrot.slane %v1033_v51, 11 }
  0x98   : > { %v2332_v2 = vrot.slane %v1036_v56, 11  ;;  %v2335_v3 = vrot.slane %v1039_v57, 11  ;;  %v1138_v4 = vmax.bf16 %v2314_v60, %v994_v48  ;;  %v1141_v5 = vmax.bf16 %v2317_v61, %v997_v49 }
  0x99   : > { %v1144_v6 = vmax.bf16 %v2320_v62, %v1000_v52  ;;  %v1147_v7 = vmax.bf16 %v2323_v63, %v1003_v53  ;;  %v1150_v8 = vmax.bf16 %v2326_v0, %v1006_v54  ;;  %v1153_v9 = vmax.bf16 %v2329_v1, %v1009_v55 }
  0x9a   : > { %v1156_v10 = vmax.bf16 %v2332_v2, %v1012_v58  ;;  %v1159_v11 = vmax.bf16 %v2335_v3, %v1015_v59  ;;  %v1171_v12 = vshrl.u32 %v1018_v34, 16  ;;  %v1186_v13 = vshrl.u32 %v1021_v35, 16 }
  0x9b   : > { %v1201_v14 = vshrl.u32 %v1024_v40, 16  ;;  %v1216_v15 = vshrl.u32 %v1027_v45, 16  ;;  %v1231_v16 = vshrl.u32 %v1030_v50, 16  ;;  %v1246_v17 = vshrl.u32 %v1033_v51, 16 }
  0x9c   : > { %v2338_v18 = vrot.slane %v1171_v12, 11  ;;  %v2341_v19 = vrot.slane %v1186_v13, 11  ;;  %v1261_v20 = vshrl.u32 %v1036_v56, 16  ;;  %v1276_v21 = vshrl.u32 %v1039_v57, 16 }
  0x9d   : > { %v2344_v22 = vrot.slane %v1201_v14, 11  ;;  %v2347_v23 = vrot.slane %v1216_v15, 11  ;;  %v2350_v24 = vrot.slane %v1231_v16, 11  ;;  %v2353_v25 = vrot.slane %v1246_v17, 11 }
  0x9e   : > { %v2356_v26 = vrot.slane %v1261_v20, 11  ;;  %v2359_v27 = vrot.slane %v1276_v21, 11  ;;  %v1306_v28 = vmax.bf16 %v2338_v18, %v1138_v4  ;;  %v1309_v29 = vmax.bf16 %v2341_v19, %v1141_v5 }
  0x9f   : > { %v1312_v30 = vmax.bf16 %v2344_v22, %v1144_v6  ;;  %v1315_v31 = vmax.bf16 %v2347_v23, %v1147_v7  ;;  %v1318_v32 = vmax.bf16 %v2350_v24, %v1150_v8  ;;  %v1321_v33 = vmax.bf16 %v2353_v25, %v1153_v9 }
  0xa0   : > { %v1324_v34 = vmax.bf16 %v2356_v26, %v1156_v10  ;;  %v1327_v35 = vmax.bf16 %v2359_v27, %v1159_v11  ;;  %v2366_v36 = vcombine.high %v1306_v28, %v1306_v28  ;;  %v2372_v37 = vcombine.high %v1309_v29, %v1309_v29 }
  0xa1   : > { %v2378_v38 = vcombine.high %v1312_v30, %v1312_v30  ;;  %v2384_v39 = vcombine.high %v1315_v31, %v1315_v31  ;;  %v2390_v40 = vcombine.high %v1318_v32, %v1318_v32  ;;  %v2396_v41 = vcombine.high %v1321_v33, %v1321_v33 }
  0xa2   : > { %v2402_v42 = vcombine.high %v1324_v34, %v1324_v34  ;;  %v2408_v43 = vcombine.high %v1327_v35, %v1327_v35  ;;  %v1556_v44 = vunpack.c.l.b16 %v2366_v36  ;;  %v1562_v45 = vunpack.c.l.b16 %v2372_v37 }
  0xa3   : > { %v1568_v46 = vunpack.c.l.b16 %v2378_v38  ;;  %v1574_v47 = vunpack.c.l.b16 %v2384_v39  ;;  %v1580_v48 = vunpack.c.l.b16 %v2390_v40  ;;  %v1586_v49 = vunpack.c.l.b16 %v2396_v41  ;;  %v2360_v39 = vld [vmem:[%s3092_s2] ss:$0 sm:$0xff] }
  0xa4   : > { %v1592_v50 = vunpack.c.l.b16 %v2402_v42  ;;  %v1598_v51 = vunpack.c.l.b16 %v2408_v43  ;;  %v1676_v52 = vrot.slane %v1562_v45, 7  ;;  %v2365_v53 = vcombine.low %v1306_v28, %v1306_v28 }
  0xa5   : > { %v1678_v54 = vrot.slane %v1568_v46, 6  ;;  %v1680_v55 = vrot.slane %v1574_v47, 5  ;;  %v1682_v56 = vrot.slane %v1580_v48, 4  ;;  %v1684_v57 = vrot.slane %v1586_v49, 3 }
  0xa6   : > { %v1677_v58 = vsel %vm1600_vm0, %v1676_v52, %v1556_v44  ;;  %v1686_v59 = vrot.slane %v1592_v50, 2  ;;  %v1688_v60 = vrot.slane %v1598_v51, 1  ;;  %v2371_v61 = vcombine.low %v1309_v29, %v1309_v29 }
  0xa7   : > { %v1679_v62 = vsel %vm1603_vm1, %v1678_v54, %v1677_v58  ;;  %v2377_v63 = vcombine.low %v1312_v30, %v1312_v30  ;;  %v2383_v0 = vcombine.low %v1315_v31, %v1315_v31  ;;  %v2389_v1 = vcombine.low %v1318_v32, %v1318_v32 }
  0xa8   : > { %v1681_v2 = vsel %vm1606_vm2, %v1680_v55, %v1679_v62  ;;  %v2395_v3 = vcombine.low %v1321_v33, %v1321_v33  ;;  %v2401_v4 = vcombine.low %v1324_v34, %v1324_v34  ;;  %v2407_v5 = vcombine.low %v1327_v35, %v1327_v35 }
  0xa9   : > { %v1683_v6 = vsel %vm1609_vm3, %v1682_v56, %v1681_v2  ;;  %v1555_v7 = vunpack.c.l.b16 %v2365_v53  ;;  %v1561_v8 = vunpack.c.l.b16 %v2371_v61  ;;  %v1567_v9 = vunpack.c.l.b16 %v2377_v63 }
  0xaa   : > { %v1685_v10 = vsel %vm1612_vm4, %v1684_v57, %v1683_v6  ;;  %v1573_v11 = vunpack.c.l.b16 %v2383_v0  ;;  %v1579_v12 = vunpack.c.l.b16 %v2389_v1  ;;  %v1585_v13 = vunpack.c.l.b16 %v2395_v3 }
  0xab   : > { %v1687_v14 = vsel %vm1615_vm5, %v1686_v59, %v1685_v10  ;;  %v1591_v15 = vunpack.c.l.b16 %v2401_v4  ;;  %v1597_v16 = vunpack.c.l.b16 %v2407_v5  ;;  %v1662_v17 = vrot.slane %v1561_v8, 7 }
  0xac   : > { %v1689_v18 = vsel %vm1618_vm6, %v1688_v60, %v1687_v14  ;;  %v1664_v19 = vrot.slane %v1567_v9, 6  ;;  %v1666_v20 = vrot.slane %v1573_v11, 5  ;;  %v1668_v21 = vrot.slane %v1579_v12, 4 }
  0xad   : > { %v1695_v22 = vpack.c.b16 %v1689_v18, %v1689_v18  ;;  %v1663_v23 = vsel %vm1600_vm0, %v1662_v17, %v1555_v7  ;;  %v1670_v24 = vrot.slane %v1585_v13, 3  ;;  %v1672_v26 = vrot.slane %v1591_v15, 2 }
  0xae   : > { %v1665_v25 = vsel %vm1603_vm1, %v1664_v19, %v1663_v23  ;;  %v1674_v28 = vrot.slane %v1597_v16, 1 }
  0xaf   : > { %2102 = vmatprep.mubr.bf16.mxu0 %v1695_v22  ;;  %v1667_v27 = vsel %vm1606_vm2, %v1666_v20, %v1665_v25 }
  0xb0   : > { %v1669_v29 = vsel %vm1609_vm3, %v1668_v21, %v1667_v27 }
  0xb1   : > { %v1671_v30 = vsel %vm1612_vm4, %v1670_v24, %v1669_v29 }
  0xb2   : > { %v1673_v31 = vsel %vm1615_vm5, %v1672_v26, %v1671_v30 }
  0xb3   : > { %v1675_v32 = vsel %vm1618_vm6, %v1674_v28, %v1673_v31 }
  0xb4   : > { %v1694_v33 = vpack.c.b16 %v1675_v32, %v1675_v32 }
  0xb6   : > { %2103 = vmatmul.mubr.bf16.vlgmr.msra.gmra.mrb[4].mxu0 %v1694_v33 }
 0x126   : > { %v2477_v34 = vpop.f32.mrb[0].mxu0 }
 0x127   : > { %v2478_v35 = vpop.f32.mrb[1].mxu0 }
 0x128   : > { %v2479_v36 = vadd.f32 %v2478_v35, %v2477_v34  ;;  %v2480_v37 = vpop.f32.mrb[2].mxu0 }
 0x129   : > { %v2481_v38 = vpop.f32.mrb[3].mxu0 }
 0x12a   : > { %v2025_v40 = vadd.f32 %v2479_v36, %v2360_v39 }
 0x158   : > { %v2499_v41 = vpop.f32.mrb[0].mxu1 }
 0x159   : > { %v2500_v42 = vpop.f32.mrb[1].mxu1 }
 0x15a   : > { %v2501_v43 = vadd.f32 %v2500_v42, %v2499_v41  ;;  %v2502_v44 = vpop.f32.mrb[2].mxu1 }
 0x15b   : > { %v2503_v45 = vpop.f32.mrb[3].mxu1 }
 0x15c   : > { %v2065_v46 = vadd.f32 %v2501_v43, %v2025_v40 }
 0x189   : > { %v2521_v47 = vpop.f32.mrb[4].mxu0 }
 0x18a   : > { %v2522_v48 = vpop.f32.mrb[5].mxu0 }
 0x18b   : > { %v2523_v49 = vadd.f32 %v2522_v48, %v2521_v47  ;;  %v2524_v50 = vpop.f32.mrb[6].mxu0 }
 0x18c   : > { %v2525_v51 = vpop.f32.mrb[7].mxu0 }
 0x18d   : > { %v2105_v52 = vadd.f32 %v2523_v49, %v2065_v46 }
 0x18f   : > { %2111 = vst.msk [vmem:[%s181_s24] sm:$0xff] %vm2110_vm7, %v2105_v52 }
 0x190   : > { %2628 = shalt.err (!%p2625_p3)
}
 0x191   : > { %s2629_s6 = scalar_lea.hbm %s3048_s28, 128  ;;  %s2633_s10 = scalar_lea.hbm %s3093_s3, 256 }
 0x192   : > { %p2630_p4 = scmp.ne.s32.totalorder %s3048_s28, %s2629_s6  ;;  %p2634_p9 = scmp.lt.u32.totalorder %s3048_s28, %s3093_s3 }
 0x193   : > { %p2635_p10 = scmp.lt.u32.totalorder %s2633_s10, %s2629_s6  ;;  %p2637_p12 = scmp.lt.u32.totalorder %s2629_s6, %s3048_s28 }
 0x194   : > { %p2631_p7 = pnand %p2630_p4, %p2738_p5 }
 0x195   : > { %p2636_p11 = por %p2635_p10, %p2634_p9 }
 0x196   : > { %p2632_p8 = pneg %p2631_p7 }
 0x197   : > { %p2638_p13 = por %p2637_p12, %p2636_p11 }
 0x199   : > { %p2639_p0 = pnand %p2638_p13, %p2632_p8 }
 0x19b   : > { %2642 = shalt.err (!%p2639_p0)
}
 0x19c   : > { %2528 = dma.vmem_to_hbm [thread:$0]  (%p2738_p5), %s3050_s25, 128, %s3048_s28, %s2113_s29  }
 0x19d PF: > { %p2534_p1 = scmp.ge.s32.totalorder %s2677_s15, 2  ;;  %s2138_s17 = sand.u32 1, %s2665_s12  }
 0x19e   : > { %s2139_s19 = scalar_lea.sflag [#allocation3], %s2138_s17 }
 0x19f   : > { %p2531_p2 = pnand %p2534_p1, %p2742_p6 }
 0x1a1   : > { %2660 = dma.done.wait (!%p2531_p2), %s2139_s19, 128  }
 0x1a2   : > { %2662 = vsyncadd (!%p2531_p2), %s2139_s19, 4294967168  ;;  %p13_p3 = scmp.ge.s32.totalorder %s2725_s18, 4   ;;  %s3096_s12 = smov %s2669_s13 }
 0x1a3   : > { %s3097_s13 = smov %s2673_s14  ;;  %s3098_s14 = smov %s2736_s21 }
 0x1a4   : > { %s3099_s15 = smov %s2725_s18  ;;  %15 = sbr.rel (!%p13_p3) target bundleno = 3 (0x3), region = 67 }
 0x1ab   :  { %2144 = vsyncpa [#allocation3], 1 }
 0x1ac   :  { %2146 = vsyncpa [#allocation3 + $0x1], 1 }

</bundles_post_ra>
